<compile_context>
chip_gen: v5e
topology: v5e:2x2
jax: 0.10.0
libtpu: 0.0.40
codegen_flags: <defaults>
</compile_context>

<pallas_src>
import functools

import jax
import jax.numpy as jnp
from jax import lax
from jax.experimental import pallas as pl
from jax.experimental.pallas import tpu as pltpu

NUM_GROUPS = 32
EPS = 1e-5
LPAD = 128  # lane-aligned halo for the flattened conv shifts (must be >= W + 1)


# --------------------------- fused GN + SiLU + 3x3 conv kernel ---------------------------
def _fused_gn_silu_conv_kernel(x_ref, a_ref, gamma_ref, beta_ref, w_ref, b_ref,
                               mask_ref, o_ref, t_ref, *, H, W, C, Cout, Cpad,
                               conv_dtype, elementwise_bf16):
    """One batch image per grid step.

    x_ref:     (1, C, H*W)       activation, NCHW flattened, native dtype
    a_ref:     (C, C)            group-averaging matrix (1/(cpg*H*W) within a group)
    gamma_ref: (C, 1), beta_ref: (C, 1)   GroupNorm affine params (f32)
    w_ref:     (9*Cpad, C)       tap-stacked conv weights (tap-major, Cout padded to Cpad)
    b_ref:     (Cout, 1)         conv bias (f32)
    mask_ref:  (8, H*W)          validity masks for the 8 non-center taps (f32 0/1)
    o_ref:     (1, Cout, H*W)    output, NCHW flattened (lane-dense store)
    t_ref:     (9*Cpad, H*W + 2*LPAD) VMEM scratch holding tap outputs with a lane halo.
               The halo is never initialized: every read that lands in it (or wraps a
               row) is discarded by the select against mask_ref, so no zeroing needed.
    """
    HW = H * W
    x = x_ref[0].astype(jnp.float32)                          # (C, HW)

    # ---- GroupNorm statistics: per-channel moments, ONE (C,C)x(C,2) group-avg matmul ----
    s_c = jnp.sum(x, axis=1, keepdims=True)                   # (C, 1) per-channel sum
    q_c = jnp.sum(x * x, axis=1, keepdims=True)               # (C, 1) per-channel sum sq
    lane = lax.broadcasted_iota(jnp.int32, (C, 2), 1)
    both = jnp.where(lane == 0, s_c, q_c)                     # (C, 2) = [sum, sumsq]
    mom = jnp.dot(a_ref[...], both, preferred_element_type=jnp.float32)   # (C, 2)
    mean_c = mom[:, 0:1]                                      # (C, 1) group mean
    var_c = jnp.maximum(mom[:, 1:2] - mean_c * mean_c, 0.0)   # clamp: avoid rsqrt(neg)
    rstd_c = lax.rsqrt(var_c + EPS)

    scale = rstd_c * gamma_ref[...]                           # (C, 1)
    shift = beta_ref[...] - mean_c * scale                    # (C, 1)

    # ---- normalize + SiLU (f32 by default; bf16 on v6e/v7x via elementwise_bf16) ----
    ew = jnp.bfloat16 if elementwise_bf16 else jnp.float32
    y = x.astype(ew) * scale.astype(ew) + shift.astype(ew)    # (C, HW)
    y = y * jax.nn.sigmoid(y)

    # ---- all 9 conv taps in ONE MXU pass: (9*Cpad, C) x (C, HW) -> (9*Cpad, HW) ----
    t = jnp.dot(w_ref[...], y.astype(conv_dtype),
                preferred_element_type=jnp.float32)           # f32 accumulate
    t_ref[:, LPAD:LPAD + HW] = t                              # lane-aligned interior store

    # ---- combine tap slabs with flat lane shifts + precomputed boundary masks ----
    acc = jnp.zeros((Cout, HW), jnp.float32)
    m = 0
    for kh in range(3):
        for kw in range(3):
            dh, dw = kh - 1, kw - 1
            s = dh * W + dw                                    # flat lane shift of this tap
            r0 = (kh * 3 + kw) * Cpad                          # 8-aligned sublane offset
            slab = t_ref[r0:r0 + Cout, LPAD + s:LPAD + s + HW]  # (Cout, HW)
            if dh == 0 and dw == 0:
                acc = acc + slab
            else:
                # Select (not multiply) so uninitialized halo / row-wrapped reads are
                # discarded regardless of their bit pattern.
                acc = acc + jnp.where(mask_ref[m:m + 1, :] > 0.5, slab, 0.0)
                m += 1

    acc = acc + b_ref[...]                                     # (Cout,1) broadcast
    o_ref[0] = acc.astype(o_ref.dtype)                         # lane-dense NCHW store


# ----------------------------------- wrapper -----------------------------------
def unet_output_layer(x_nchw, gamma, beta, w_oihw, bias, *,
                      conv_dtype=jnp.bfloat16, elementwise_bf16=False):
    """Forward pass equivalent to the PyTorch module (NCHW in, NCHW out).

    conv_dtype:      dtype of the conv-matmul inputs (bf16 hits the native MXU path,
                     f32 accumulation; pass jnp.float32 for exact f32).
    elementwise_bf16: run normalize+SiLU in bf16 (recommended on v6e/v7x; keep False
                     on v5e which has no bf16 VPU/EUP path).
    """
    N, C, H, W = x_nchw.shape
    Cout = w_oihw.shape[0]
    assert C % NUM_GROUPS == 0
    assert W + 1 <= LPAD
    HW = H * W
    cpg = C // NUM_GROUPS
    Cpad = ((Cout + 7) // 8) * 8      # pad taps to 8-aligned sublane slabs

    # NCHW -> (N, C, H*W): metadata-only reshape, native dtype (no extra HBM pass).
    x2 = x_nchw.reshape(N, C, HW)

    # Group-averaging matrix: A[c, c'] = 1/(cpg*H*W) if c, c' in the same group else 0.
    grp = jnp.arange(C) // cpg
    A = (grp[:, None] == grp[None, :]).astype(jnp.float32) / float(cpg * HW)   # (C, C)

    gamma2 = gamma.reshape(C, 1).astype(jnp.float32)
    beta2 = beta.reshape(C, 1).astype(jnp.float32)

    # (Cout, Cin, 3, 3) -> tap-major stacked (9*Cpad, Cin), cast to the MXU input dtype.
    w_t = jnp.transpose(w_oihw, (2, 3, 0, 1)).reshape(9, Cout, C)
    w_t = jnp.pad(w_t, ((0, 0), (0, Cpad - Cout), (0, 0))).reshape(9 * Cpad, C)
    w_t = w_t.astype(conv_dtype)
    bias2 = bias.reshape(Cout, 1).astype(jnp.float32)

    # Boundary-validity masks for the 8 non-center taps (precomputed; no per-image
    # iota / integer div / mod inside the kernel).
    hh, ww = jnp.meshgrid(jnp.arange(H), jnp.arange(W), indexing="ij")
    hh = hh.reshape(1, HW)
    ww = ww.reshape(1, HW)
    mrows = []
    for kh in range(3):
        for kw in range(3):
            dh, dw = kh - 1, kw - 1
            if dh == 0 and dw == 0:
                continue
            mrows.append((hh + dh >= 0) & (hh + dh < H) & (ww + dw >= 0) & (ww + dw < W))
    masks = jnp.concatenate(mrows, axis=0).astype(jnp.float32)        # (8, HW)

    # VMEM budget: real footprint (double-buffered blocks + tap scratch + live temps)
    # plus headroom, capped at 40 MiB so the compiler keeps pipelining slack on v7x.
    in_bytes = x2.dtype.itemsize
    est = (2 * C * HW * in_bytes                       # input double buffer
           + 2 * Cout * HW * x2.dtype.itemsize         # output double buffer
           + 9 * Cpad * (HW + 2 * LPAD) * 4            # tap scratch
           + C * HW * (4 + 4 + 2)                      # x_f32 / y / y_bf16 temps
           + 9 * Cpad * HW * 4                         # matmul result
           + 2 * (9 * Cpad * C * 2 + C * C * 4 + 8 * HW * 4 + 4 * C * 4)  # params
           + (4 << 20))                                # headroom
    vmem_limit = int(min(max(est, 16 << 20), 40 << 20))

    out = pl.pallas_call(
        functools.partial(_fused_gn_silu_conv_kernel, H=H, W=W, C=C, Cout=Cout,
                          Cpad=Cpad, conv_dtype=conv_dtype,
                          elementwise_bf16=elementwise_bf16),
        out_shape=jax.ShapeDtypeStruct((N, Cout, HW), x_nchw.dtype),
        grid=(N,),
        in_specs=[
            pl.BlockSpec((1, C, HW), lambda n: (n, 0, 0)),
            pl.BlockSpec((C, C), lambda n: (0, 0)),
            pl.BlockSpec((C, 1), lambda n: (0, 0)),
            pl.BlockSpec((C, 1), lambda n: (0, 0)),
            pl.BlockSpec((9 * Cpad, C), lambda n: (0, 0)),
            pl.BlockSpec((Cout, 1), lambda n: (0, 0)),
            pl.BlockSpec((8, HW), lambda n: (0, 0)),
        ],
        out_specs=pl.BlockSpec((1, Cout, HW), lambda n: (n, 0, 0)),
        scratch_shapes=[pltpu.VMEM((9 * Cpad, HW + 2 * LPAD), jnp.float32)],
        compiler_params=pltpu.CompilerParams(
            dimension_semantics=("parallel",),
            vmem_limit_bytes=vmem_limit),
    )(x2, A, gamma2, beta2, w_t, bias2, masks)

    # metadata-only reshape back to NCHW (no transpose, no extra HBM pass)
    return out.reshape(N, Cout, H, W)


# ----------------------------- pure-JAX reference for validation ------------------------
def _reference(x, gamma, beta, w, b):
    N, C, H, W = x.shape
    xg = x.reshape(N, NUM_GROUPS, C // NUM_GROUPS, H, W)
    mean = xg.mean(axis=(2, 3, 4), keepdims=True)
    var = xg.var(axis=(2, 3, 4), keepdims=True)
    xn = ((xg - mean) / jnp.sqrt(var + EPS)).reshape(N, C, H, W)
    xn = xn * gamma[None, :, None, None] + beta[None, :, None, None]
    y = xn * jax.nn.sigmoid(xn)
    out = lax.conv_general_dilated(
        y, w, window_strides=(1, 1), padding=((1, 1), (1, 1)),
        dimension_numbers=("NCHW", "OIHW", "NCHW"))
    return out + b[None, :, None, None]


if __name__ == "__main__":
    # Small shapes consistent with the module: in_channels must be divisible by 32.
    N, Cin, Cout, H, W = 2, 64, 4, 16, 16

    key = jax.random.PRNGKey(0)
    kx, kg, kb, kw, kbias = jax.random.split(key, 5)

    x = jax.random.normal(kx, (N, Cin, H, W), dtype=jnp.float32)
    # GroupNorm affine params (perturbed from PyTorch defaults so the affine path is exercised).
    gamma = jnp.ones((Cin,), jnp.float32) + 0.1 * jax.random.normal(kg, (Cin,), jnp.float32)
    beta = 0.1 * jax.random.normal(kb, (Cin,), jnp.float32)
    # Conv2d params (PyTorch layout: (Cout, Cin, 3, 3)).
    w = 0.1 * jax.random.normal(kw, (Cout, Cin, 3, 3), dtype=jnp.float32)
    bias = 0.1 * jax.random.normal(kbias, (Cout,), dtype=jnp.float32)

    out = jax.block_until_ready(unet_output_layer(x, gamma, beta, w, bias))
    ref = jax.block_until_ready(_reference(x, gamma, beta, w, bias))

    assert out.shape == (N, Cout, H, W), out.shape
    # Tolerance accounts for bf16 conv-matmul inputs (f32 accumulation); the f32
    # reference conv is bit-different by design.
    assert jnp.allclose(out, ref, atol=2e-2, rtol=2e-2), float(jnp.max(jnp.abs(out - ref)))
    print("KERNEL_OK")
</pallas_src>

<mosaic_0001>
module attributes {stable_mosaic.version = 11 : i64} {
  func.func @_fused_gn_silu_conv_kernel(%arg0: i32, %arg1: memref<1x64x256xf32, #tpu.memory_space<vmem>>, %arg2: memref<64x64xf32, #tpu.memory_space<vmem>>, %arg3: memref<64x1xf32, #tpu.memory_space<vmem>>, %arg4: memref<64x1xf32, #tpu.memory_space<vmem>>, %arg5: memref<72x64xbf16, #tpu.memory_space<vmem>>, %arg6: memref<4x1xf32, #tpu.memory_space<vmem>>, %arg7: memref<8x256xf32, #tpu.memory_space<vmem>>, %arg8: memref<1x4x256xf32, #tpu.memory_space<vmem>>, %arg9: memref<72x512xf32, #tpu.memory_space<vmem>>) attributes {dimension_semantics = [#tpu.dimension_semantics<parallel>], iteration_bounds = array<i64: 2>, scalar_prefetch = 0 : i64, scratch_operands = 1 : i64, tpu.core_type = #tpu.core_type<tc>, window_params = [{transform_indices = @transform_0, window_bounds = array<i64: 1, 64, 256>}, {pipeline_mode = #tpu.pipeline_mode<synchronous>, transform_indices = @transform_1, window_bounds = array<i64: 64, 64>}, {pipeline_mode = #tpu.pipeline_mode<synchronous>, transform_indices = @transform_2, window_bounds = array<i64: 64, 1>}, {pipeline_mode = #tpu.pipeline_mode<synchronous>, transform_indices = @transform_3, window_bounds = array<i64: 64, 1>}, {pipeline_mode = #tpu.pipeline_mode<synchronous>, transform_indices = @transform_4, window_bounds = array<i64: 72, 64>}, {pipeline_mode = #tpu.pipeline_mode<synchronous>, transform_indices = @transform_5, window_bounds = array<i64: 4, 1>}, {pipeline_mode = #tpu.pipeline_mode<synchronous>, transform_indices = @transform_6, window_bounds = array<i64: 8, 256>}, {transform_indices = @transform_7, window_bounds = array<i64: 1, 4, 256>}]} {
    %c0 = arith.constant 0 : index
    %c0_0 = arith.constant 0 : index
    %c0_1 = arith.constant 0 : index
    %0 = vector.load %arg1[%c0, %c0_0, %c0_1] : memref<1x64x256xf32, #tpu.memory_space<vmem>>, vector<1x64x256xf32>
    %1 = vector.shape_cast %0 : vector<1x64x256xf32> to vector<64x256xf32>
    %cst = arith.constant dense<0.000000e+00> : vector<64xf32>
    %2 = vector.multi_reduction <add>, %1, %cst [1] : vector<64x256xf32> to vector<64xf32>
    %3 = vector.shape_cast %2 : vector<64xf32> to vector<64x1xf32>
    %4 = arith.mulf %1, %1 : vector<64x256xf32>
    %cst_2 = arith.constant dense<0.000000e+00> : vector<64xf32>
    %5 = vector.multi_reduction <add>, %4, %cst_2 [1] : vector<64x256xf32> to vector<64xf32>
    %6 = vector.shape_cast %5 : vector<64xf32> to vector<64x1xf32>
    %7 = tpu.iota {dimensions = array<i32: 1>} : vector<64x2xi32>
    %c0_i32 = arith.constant 0 : i32
    %8 = vector.broadcast %c0_i32 : i32 to vector<64x2xi32>
    %9 = arith.cmpi eq, %7, %8 : vector<64x2xi32>
    %10 = vector.shape_cast %3 : vector<64x1xf32> to vector<64x1xf32>
    %11 = vector.broadcast %10 : vector<64x1xf32> to vector<64x2xf32>
    %12 = vector.shape_cast %6 : vector<64x1xf32> to vector<64x1xf32>
    %13 = vector.broadcast %12 : vector<64x1xf32> to vector<64x2xf32>
    %14 = arith.select %9, %11, %13 : vector<64x2xi1>, vector<64x2xf32>
    %c0_3 = arith.constant 0 : index
    %c0_4 = arith.constant 0 : index
    %15 = vector.load %arg2[%c0_3, %c0_4] : memref<64x64xf32, #tpu.memory_space<vmem>>, vector<64x64xf32>
    %cst_5 = arith.constant dense<0.000000e+00> : vector<64x2xf32>
    %16 = tpu.matmul %15, %14, %cst_5 {dimension_numbers = #tpu.dot_dimension_numbers<[1], [0], [0], [1], [0, 0, 1, 1], [], []>} : vector<64x64xf32>, vector<64x2xf32>, vector<64x2xf32> -> vector<64x2xf32>
    %17 = vector.extract_strided_slice %16 {offsets = [0, 0], sizes = [64, 1], strides = [1, 1]} : vector<64x2xf32> to vector<64x1xf32>
    %18 = vector.extract_strided_slice %16 {offsets = [0, 1], sizes = [64, 1], strides = [1, 1]} : vector<64x2xf32> to vector<64x1xf32>
    %19 = arith.mulf %17, %17 : vector<64x1xf32>
    %20 = arith.subf %18, %19 : vector<64x1xf32>
    %cst_6 = arith.constant 0.000000e+00 : f32
    %21 = vector.broadcast %cst_6 : f32 to vector<64x1xf32>
    %22 = arith.maximumf %20, %21 : vector<64x1xf32>
    %cst_7 = arith.constant 9.99999974E-6 : f32
    %23 = vector.broadcast %cst_7 : f32 to vector<64x1xf32>
    %24 = arith.addf %22, %23 : vector<64x1xf32>
    %25 = math.rsqrt %24 : vector<64x1xf32>
    %c0_8 = arith.constant 0 : index
    %c0_9 = arith.constant 0 : index
    %26 = vector.load %arg3[%c0_8, %c0_9] : memref<64x1xf32, #tpu.memory_space<vmem>>, vector<64x1xf32>
    %27 = arith.mulf %25, %26 : vector<64x1xf32>
    %c0_10 = arith.constant 0 : index
    %c0_11 = arith.constant 0 : index
    %28 = vector.load %arg4[%c0_10, %c0_11] : memref<64x1xf32, #tpu.memory_space<vmem>>, vector<64x1xf32>
    %29 = arith.mulf %17, %27 : vector<64x1xf32>
    %30 = arith.subf %28, %29 : vector<64x1xf32>
    %31 = vector.broadcast %27 : vector<64x1xf32> to vector<64x256xf32>
    %32 = arith.mulf %1, %31 : vector<64x256xf32>
    %33 = vector.broadcast %30 : vector<64x1xf32> to vector<64x256xf32>
    %34 = arith.addf %32, %33 : vector<64x256xf32>
    %35 = arith.negf %34 : vector<64x256xf32>
    %36 = math.exp %35 : vector<64x256xf32>
    %cst_12 = arith.constant 1.000000e+00 : f32
    %37 = vector.broadcast %cst_12 : f32 to vector<64x256xf32>
    %38 = arith.addf %37, %36 : vector<64x256xf32>
    %39 = arith.divf %37, %38 : vector<64x256xf32>
    %40 = arith.mulf %34, %39 : vector<64x256xf32>
    %c0_13 = arith.constant 0 : index
    %c0_14 = arith.constant 0 : index
    %41 = vector.load %arg5[%c0_13, %c0_14] : memref<72x64xbf16, #tpu.memory_space<vmem>>, vector<72x64xbf16>
    %42 = arith.truncf %40 : vector<64x256xf32> to vector<64x256xbf16>
    %cst_15 = arith.constant dense<0.000000e+00> : vector<72x256xf32>
    %43 = tpu.matmul %41, %42, %cst_15 {dimension_numbers = #tpu.dot_dimension_numbers<[1], [0], [0], [1], [0, 0, 1, 1], [], []>} : vector<72x64xbf16>, vector<64x256xbf16>, vector<72x256xf32> -> vector<72x256xf32>
    %c0_16 = arith.constant 0 : index
    %c128 = arith.constant 128 : index
    %44 = vector.load %arg9[%c0_16, %c128] : memref<72x512xf32, #tpu.memory_space<vmem>>, vector<72x256xf32>
    tpu.vector_store %arg9[%c0_16, %c128], %43 {strides = array<i32>} : memref<72x512xf32, #tpu.memory_space<vmem>>, vector<72x256xf32>,
    %cst_17 = arith.constant 0.000000e+00 : f32
    %45 = vector.broadcast %cst_17 : f32 to vector<4x256xf32>
    %c0_18 = arith.constant 0 : index
    %c111 = arith.constant 111 : index
    %46 = vector.load %arg9[%c0_18, %c111] : memref<72x512xf32, #tpu.memory_space<vmem>>, vector<4x256xf32>
    %c0_19 = arith.constant 0 : index
    %c0_20 = arith.constant 0 : index
    %47 = vector.load %arg7[%c0_19, %c0_20] : memref<8x256xf32, #tpu.memory_space<vmem>>, vector<1x256xf32>
    %cst_21 = arith.constant 5.000000e-01 : f32
    %48 = vector.broadcast %cst_21 : f32 to vector<1x256xf32>
    %49 = arith.cmpf ogt, %47, %48 : vector<1x256xf32>
    %cst_22 = arith.constant 0.000000e+00 : f32
    %50 = vector.shape_cast %49 : vector<1x256xi1> to vector<1x256xi1>
    %51 = vector.broadcast %50 : vector<1x256xi1> to vector<4x256xi1>
    %52 = vector.broadcast %cst_22 : f32 to vector<4x256xf32>
    %53 = arith.select %51, %46, %52 : vector<4x256xi1>, vector<4x256xf32>
    %54 = arith.addf %45, %53 : vector<4x256xf32>
    %c8 = arith.constant 8 : index
    %c112 = arith.constant 112 : index
    %55 = vector.load %arg9[%c8, %c112] : memref<72x512xf32, #tpu.memory_space<vmem>>, vector<4x256xf32>
    %c1 = arith.constant 1 : index
    %c0_23 = arith.constant 0 : index
    %56 = vector.load %arg7[%c1, %c0_23] : memref<8x256xf32, #tpu.memory_space<vmem>>, vector<1x256xf32>
    %cst_24 = arith.constant 5.000000e-01 : f32
    %57 = vector.broadcast %cst_24 : f32 to vector<1x256xf32>
    %58 = arith.cmpf ogt, %56, %57 : vector<1x256xf32>
    %cst_25 = arith.constant 0.000000e+00 : f32
    %59 = vector.shape_cast %58 : vector<1x256xi1> to vector<1x256xi1>
    %60 = vector.broadcast %59 : vector<1x256xi1> to vector<4x256xi1>
    %61 = vector.broadcast %cst_25 : f32 to vector<4x256xf32>
    %62 = arith.select %60, %55, %61 : vector<4x256xi1>, vector<4x256xf32>
    %63 = arith.addf %54, %62 : vector<4x256xf32>
    %c16 = arith.constant 16 : index
    %c113 = arith.constant 113 : index
    %64 = vector.load %arg9[%c16, %c113] : memref<72x512xf32, #tpu.memory_space<vmem>>, vector<4x256xf32>
    %c2 = arith.constant 2 : index
    %c0_26 = arith.constant 0 : index
    %65 = vector.load %arg7[%c2, %c0_26] : memref<8x256xf32, #tpu.memory_space<vmem>>, vector<1x256xf32>
    %cst_27 = arith.constant 5.000000e-01 : f32
    %66 = vector.broadcast %cst_27 : f32 to vector<1x256xf32>
    %67 = arith.cmpf ogt, %65, %66 : vector<1x256xf32>
    %cst_28 = arith.constant 0.000000e+00 : f32
    %68 = vector.shape_cast %67 : vector<1x256xi1> to vector<1x256xi1>
    %69 = vector.broadcast %68 : vector<1x256xi1> to vector<4x256xi1>
    %70 = vector.broadcast %cst_28 : f32 to vector<4x256xf32>
    %71 = arith.select %69, %64, %70 : vector<4x256xi1>, vector<4x256xf32>
    %72 = arith.addf %63, %71 : vector<4x256xf32>
    %c24 = arith.constant 24 : index
    %c127 = arith.constant 127 : index
    %73 = vector.load %arg9[%c24, %c127] : memref<72x512xf32, #tpu.memory_space<vmem>>, vector<4x256xf32>
    %c3 = arith.constant 3 : index
    %c0_29 = arith.constant 0 : index
    %74 = vector.load %arg7[%c3, %c0_29] : memref<8x256xf32, #tpu.memory_space<vmem>>, vector<1x256xf32>
    %cst_30 = arith.constant 5.000000e-01 : f32
    %75 = vector.broadcast %cst_30 : f32 to vector<1x256xf32>
    %76 = arith.cmpf ogt, %74, %75 : vector<1x256xf32>
    %cst_31 = arith.constant 0.000000e+00 : f32
    %77 = vector.shape_cast %76 : vector<1x256xi1> to vector<1x256xi1>
    %78 = vector.broadcast %77 : vector<1x256xi1> to vector<4x256xi1>
    %79 = vector.broadcast %cst_31 : f32 to vector<4x256xf32>
    %80 = arith.select %78, %73, %79 : vector<4x256xi1>, vector<4x256xf32>
    %81 = arith.addf %72, %80 : vector<4x256xf32>
    %c32 = arith.constant 32 : index
    %c128_32 = arith.constant 128 : index
    %82 = vector.load %arg9[%c32, %c128_32] : memref<72x512xf32, #tpu.memory_space<vmem>>, vector<4x256xf32>
    %83 = arith.addf %81, %82 : vector<4x256xf32>
    %c40 = arith.constant 40 : index
    %c129 = arith.constant 129 : index
    %84 = vector.load %arg9[%c40, %c129] : memref<72x512xf32, #tpu.memory_space<vmem>>, vector<4x256xf32>
    %c4 = arith.constant 4 : index
    %c0_33 = arith.constant 0 : index
    %85 = vector.load %arg7[%c4, %c0_33] : memref<8x256xf32, #tpu.memory_space<vmem>>, vector<1x256xf32>
    %cst_34 = arith.constant 5.000000e-01 : f32
    %86 = vector.broadcast %cst_34 : f32 to vector<1x256xf32>
    %87 = arith.cmpf ogt, %85, %86 : vector<1x256xf32>
    %cst_35 = arith.constant 0.000000e+00 : f32
    %88 = vector.shape_cast %87 : vector<1x256xi1> to vector<1x256xi1>
    %89 = vector.broadcast %88 : vector<1x256xi1> to vector<4x256xi1>
    %90 = vector.broadcast %cst_35 : f32 to vector<4x256xf32>
    %91 = arith.select %89, %84, %90 : vector<4x256xi1>, vector<4x256xf32>
    %92 = arith.addf %83, %91 : vector<4x256xf32>
    %c48 = arith.constant 48 : index
    %c143 = arith.constant 143 : index
    %93 = vector.load %arg9[%c48, %c143] : memref<72x512xf32, #tpu.memory_space<vmem>>, vector<4x256xf32>
    %c5 = arith.constant 5 : index
    %c0_36 = arith.constant 0 : index
    %94 = vector.load %arg7[%c5, %c0_36] : memref<8x256xf32, #tpu.memory_space<vmem>>, vector<1x256xf32>
    %cst_37 = arith.constant 5.000000e-01 : f32
    %95 = vector.broadcast %cst_37 : f32 to vector<1x256xf32>
    %96 = arith.cmpf ogt, %94, %95 : vector<1x256xf32>
    %cst_38 = arith.constant 0.000000e+00 : f32
    %97 = vector.shape_cast %96 : vector<1x256xi1> to vector<1x256xi1>
    %98 = vector.broadcast %97 : vector<1x256xi1> to vector<4x256xi1>
    %99 = vector.broadcast %cst_38 : f32 to vector<4x256xf32>
    %100 = arith.select %98, %93, %99 : vector<4x256xi1>, vector<4x256xf32>
    %101 = arith.addf %92, %100 : vector<4x256xf32>
    %c56 = arith.constant 56 : index
    %c144 = arith.constant 144 : index
    %102 = vector.load %arg9[%c56, %c144] : memref<72x512xf32, #tpu.memory_space<vmem>>, vector<4x256xf32>
    %c6 = arith.constant 6 : index
    %c0_39 = arith.constant 0 : index
    %103 = vector.load %arg7[%c6, %c0_39] : memref<8x256xf32, #tpu.memory_space<vmem>>, vector<1x256xf32>
    %cst_40 = arith.constant 5.000000e-01 : f32
    %104 = vector.broadcast %cst_40 : f32 to vector<1x256xf32>
    %105 = arith.cmpf ogt, %103, %104 : vector<1x256xf32>
    %cst_41 = arith.constant 0.000000e+00 : f32
    %106 = vector.shape_cast %105 : vector<1x256xi1> to vector<1x256xi1>
    %107 = vector.broadcast %106 : vector<1x256xi1> to vector<4x256xi1>
    %108 = vector.broadcast %cst_41 : f32 to vector<4x256xf32>
    %109 = arith.select %107, %102, %108 : vector<4x256xi1>, vector<4x256xf32>
    %110 = arith.addf %101, %109 : vector<4x256xf32>
    %c64 = arith.constant 64 : index
    %c145 = arith.constant 145 : index
    %111 = vector.load %arg9[%c64, %c145] : memref<72x512xf32, #tpu.memory_space<vmem>>, vector<4x256xf32>
    %c7 = arith.constant 7 : index
    %c0_42 = arith.constant 0 : index
    %112 = vector.load %arg7[%c7, %c0_42] : memref<8x256xf32, #tpu.memory_space<vmem>>, vector<1x256xf32>
    %cst_43 = arith.constant 5.000000e-01 : f32
    %113 = vector.broadcast %cst_43 : f32 to vector<1x256xf32>
    %114 = arith.cmpf ogt, %112, %113 : vector<1x256xf32>
    %cst_44 = arith.constant 0.000000e+00 : f32
    %115 = vector.shape_cast %114 : vector<1x256xi1> to vector<1x256xi1>
    %116 = vector.broadcast %115 : vector<1x256xi1> to vector<4x256xi1>
    %117 = vector.broadcast %cst_44 : f32 to vector<4x256xf32>
    %118 = arith.select %116, %111, %117 : vector<4x256xi1>, vector<4x256xf32>
    %119 = arith.addf %110, %118 : vector<4x256xf32>
    %c0_45 = arith.constant 0 : index
    %c0_46 = arith.constant 0 : index
    %120 = vector.load %arg6[%c0_45, %c0_46] : memref<4x1xf32, #tpu.memory_space<vmem>>, vector<4x1xf32>
    %121 = vector.broadcast %120 : vector<4x1xf32> to vector<4x256xf32>
    %122 = arith.addf %119, %121 : vector<4x256xf32>
    %c0_47 = arith.constant 0 : index
    %c0_48 = arith.constant 0 : index
    %c0_49 = arith.constant 0 : index
    %123 = vector.load %arg8[%c0_47, %c0_48, %c0_49] : memref<1x4x256xf32, #tpu.memory_space<vmem>>, vector<1x4x256xf32>
    %124 = vector.shape_cast %123 : vector<1x4x256xf32> to vector<4x256xf32>
    %125 = vector.shape_cast %122 : vector<4x256xf32> to vector<1x4x256xf32>
    tpu.vector_store %arg8[%c0_47, %c0_48, %c0_49], %125 {strides = array<i32>} : memref<1x4x256xf32, #tpu.memory_space<vmem>>, vector<1x4x256xf32>,
    return
  }
  func.func @transform_0(%arg0: i32) -> (i32, i32, i32) {
    %c0_i32 = arith.constant 0 : i32
    %c0_i32_0 = arith.constant 0 : i32
    %c0_i32_1 = arith.constant 0 : i32
    return %arg0, %c0_i32, %c0_i32_0 : i32, i32, i32
  }
  func.func @transform_1(%arg0: i32) -> (i32, i32) {
    %c0_i32 = arith.constant 0 : i32
    %c0_i32_0 = arith.constant 0 : i32
    %c0_i32_1 = arith.constant 0 : i32
    return %c0_i32, %c0_i32_0 : i32, i32
  }
  func.func @transform_2(%arg0: i32) -> (i32, i32) {
    %c0_i32 = arith.constant 0 : i32
    %c0_i32_0 = arith.constant 0 : i32
    %c0_i32_1 = arith.constant 0 : i32
    return %c0_i32, %c0_i32_0 : i32, i32
  }
  func.func @transform_3(%arg0: i32) -> (i32, i32) {
    %c0_i32 = arith.constant 0 : i32
    %c0_i32_0 = arith.constant 0 : i32
    %c0_i32_1 = arith.constant 0 : i32
    return %c0_i32, %c0_i32_0 : i32, i32
  }
  func.func @transform_4(%arg0: i32) -> (i32, i32) {
    %c0_i32 = arith.constant 0 : i32
    %c0_i32_0 = arith.constant 0 : i32
    %c0_i32_1 = arith.constant 0 : i32
    return %c0_i32, %c0_i32_0 : i32, i32
  }
  func.func @transform_5(%arg0: i32) -> (i32, i32) {
    %c0_i32 = arith.constant 0 : i32
    %c0_i32_0 = arith.constant 0 : i32
    %c0_i32_1 = arith.constant 0 : i32
    return %c0_i32, %c0_i32_0 : i32, i32
  }
  func.func @transform_6(%arg0: i32) -> (i32, i32) {
    %c0_i32 = arith.constant 0 : i32
    %c0_i32_0 = arith.constant 0 : i32
    %c0_i32_1 = arith.constant 0 : i32
    return %c0_i32, %c0_i32_0 : i32, i32
  }
  func.func @transform_7(%arg0: i32) -> (i32, i32, i32) {
    %c0_i32 = arith.constant 0 : i32
    %c0_i32_0 = arith.constant 0 : i32
    %c0_i32_1 = arith.constant 0 : i32
    return %arg0, %c0_i32, %c0_i32_0 : i32, i32, i32
  }
}

</mosaic_0001>

<bundles_post_ra>
// kernel: tpu_custom_call.1
= control target key start
LH: loop header
LB: loop body
LE: loop exit
PB: predicated region body
PF: predicated region fallthrough
CT: control target
= control target key end

     0   :  { %12 = vsyncpa [#allocation4], 0  ;;  %s3154_s0 = inlined_call_operand.hbm [shape: f32[2,64,256], index: 0, kind: input, shape index: {}]   ;;  %s3155_s1 = inlined_call_operand.vmem [shape: f32[64,64], index: 1, kind: input, shape index: {}]   ;;  %s3156_s2 = inlined_call_operand.vmem [shape: f32[64,1], index: 2, kind: input, shape index: {}]   ;;  %s3157_s3 = inlined_call_operand.vmem [shape: f32[64,1], index: 3, kind: input, shape index: {}]   ;;  %s3158_s4 = inlined_call_operand.vmem [shape: bf16[72,64], index: 4, kind: input, shape index: {}]   ;;  %s3159_s5 = inlined_call_operand.vmem [shape: f32[4,1], index: 5, kind: input, shape index: {}]   ;;  %s3160_s6 = inlined_call_operand.vmem [shape: f32[8,256], index: 6, kind: input, shape index: {}]   ;;  %s3161_s7 = inlined_call_operand.hbm [shape: f32[2,4,256], index: 7, kind: output, shape index: {}]  }
   0x1   :  { %14 = vsyncpa [#allocation4 + $0x1], 0 }
   0x2   :  { %15 = vsyncpa [#allocation5], 0 }
   0x3   :  { %17 = vsyncpa [#allocation5 + $0x1], 0  ;;  %s1997_s24 = smov 0   ;;  %s1999_s25 = smov 0  }
   0x4   :  { %s2001_s26 = smov 0   ;;  %s2003_s27 = smov 0  }
   0x5 LB: > { %s2018_s28 = sadd.s32 4294967295, %s1943_s27   ;;  %s1613_s29 = sadd.s32 4294967294, %s1943_s27   ;;  %s1943_s27 = sphi %s2003_s27, %s3257_s27   ;;  %s1939_s26 = sphi %s2001_s26, %s3256_s26   ;;  %s1935_s25 = sphi %s1999_s25, %s3255_s25   ;;  %s1931_s24 = sphi %s1997_s24, %s3254_s24  }
   0x6   : > { %s2022_s30 = sadd.s32 1, %s1943_s27   ;;  %s30_s8 = sadd.s32 1, %s1939_s26 }
   0x7   : > { %s27_s9 = ssub.s32 %s1943_s27, %s2022_s30  ;;  %p37_p0 = scmp.ne.s32.totalorder %s1939_s26, %s1935_s25 }
   0x8   : > { %p28_p1 = scmp.eq.s32.totalorder %s27_s9, 0  ;;  %p38_p2 = scmp.eq.s32.totalorder %s1943_s27, 0 }
   0x9   : > { %p43_p3 = scmp.ne.s32.totalorder %s1935_s25, %s1931_s24  ;;  %p44_p4 = scmp.eq.s32.totalorder %s2018_s28, 0 }
   0xa   : > { %s2034_s10 = scalar_select %p28_p1, %s1939_s26, %s30_s8  }
   0xb   : > { %p2036_p5 = por %p38_p2, %p37_p0  ;;  %p2040_p6 = por %p44_p4, %p43_p3 }
   0xc   : > { %3165 = sst [smem:[#allocation9_spill]] %s2034_s10  ;;  %p193_p7 = scmp.eq.s32.totalorder %s2018_s28, 1 }
   0xd   : > { %p199_p8 = scmp.eq.s32.totalorder %s1613_s29, 1  ;;  %p1710_p10 = scmp.lt.s32.totalorder %s1943_s27, 2 }
   0xe   : > { %p2047_p11 = por %p193_p7, %p37_p0  ;;  %s237_s15 = sand.u32 1, %s1939_s26  }
   0xf   : > { %p2051_p12 = por %p199_p8, %p43_p3  ;;  %s1684_s16 = sshll.u32 %s1943_s27, 7 }
  0x10   : > { %s1616_s17 = sshll.u32 %s237_s15, 7  ;;  %s246_s20 = scalar_lea.hbm %s3154_s0, %s1684_s16 }
  0x11   : > { %s247_s21 = sshll.u32 %s246_s20, 4  ;;  %s241_s22 = scalar_lea.vmem [#allocation3], %s1616_s17  ;;  %s248_s21 = int_to_ptr.hbm [resolvable:$true] %s247_s21 }
  0x12   : > { %s249_s23 = sshll.u32 %s241_s22, 4  ;;  %p2062_p13 = pnand %p1710_p10, %p2036_p5  ;;  %s250_s23 = int_to_ptr.vmem [resolvable:$true] %s249_s23 }
  0x13   : > { %p1619_p0 = scmp.ge.s32.totalorder %s1943_s27, 1  ;;  %p257_p1 = scmp.lt.s32.totalorder %s1943_s27, 3 }
  0x14   : > { %s238_s8 = scalar_lea.sflag [#allocation4], %s237_s15  ;;  %s1847_s9 = sshra.s32 %s248_s21, 4  ;;  %s1848_s9 = int_to_ptr.hbm [resolvable:$true] %s1847_s9 }
  0x15   : > { %s1849_s10 = scalar_lea.hbm %s1848_s9, 128  ;;  %p1851_p3 = pneg %p2062_p13 }
  0x16   : > { %p1850_p2 = scmp.ne.s32.totalorder %s1848_s9, %s1849_s10  ;;  %s1854_s11 = scalar_lea.hbm %s3154_s0, 256 }
  0x17   : > { %p1855_p5 = scmp.lt.s32.totalorder %s1848_s9, %s3154_s0  ;;  %p1856_p8 = scmp.lt.s32.totalorder %s1854_s11, %s1849_s10 }
  0x18   : > { %p1852_p4 = pnand %p1851_p3, %p1850_p2 }
  0x19   : > { %p1857_p10 = por %p1856_p8, %p1855_p5 }
  0x1a   : > { %p1853_p7 = pneg %p1852_p4 }
  0x1c   : > { %p1858_p9 = pnand %p1857_p10, %p1853_p7 }
  0x1e   : > { %1861 = shalt.err (!%p1858_p9)
}
  0x1f   : > { %s1945_s15 = smov 256   ;;  %s1946_s20 = smov 16  }
  0x20   : > { %1705 = dma.hbm_to_vmem [thread:$0]  (!%p2062_p13), %s248_s21, 2048, %s250_s23, %s238_s8, %s1945_s15, %s1945_s15, %s1946_s20  }
  0x21   : > { %p258_p2 = pnand %p1619_p0, %p257_p1 }
  0x22   : > { %s2083_s22 = sand.u32 (!%p258_p2), 1, %s1935_s25  }
  0x23   : > { %261 = sbr.rel (%p258_p2) target bundleno = 1142 (0x476), region = 48  ;;  %s1620_s10 = sshll.u32 (!%p258_p2), %s2083_s22, 7 }
  0x24   : > { %s264_s9 = scalar_lea.sflag (!%p258_p2), [#allocation4], %s2083_s22  ;;  %s2087_s16 = scalar_lea.vmem (!%p258_p2), [#allocation3], %s1620_s10 }
  0x28   : > { %1922 = dma.done.wait (%p2040_p6), %s264_s9, 2048  }
  0x29   : > { %1924 = vsyncadd (%p2040_p6), %s264_s9, 4294965248  ;;  %v2094_v0 = vld [vmem:[%s2087_s16 + $0x70] sm:$0xff]  ;;  %v2097_v1 = vld [vmem:[%s2087_s16 + $0x78] sm:$0xff]  ;;  %v380_v48 = vlaneseq  ;;  %vm3162_vm1 = vcmask 523264   ;;  %s1947_s29 = smov 1   ;;  %s1949_s19 = smov 127  }
  0x2a   : > { %v2100_v2 = vld [vmem:[%s2087_s16 + $0x60] sm:$0xff]  ;;  %v337_v3 = vadd.f32 %v2097_v1, %v2094_v0  ;;  %v2105_v4 = vld [vmem:[%s2087_s16 + $0x68] sm:$0xff]  ;;  %v2108_v5 = vld [vmem:[%s2087_s16 + $0x50] sm:$0xff]  ;;  %v354_v9 = vmul.f32 %v2094_v0, %v2094_v0  ;;  %v355_v10 = vmul.f32 %v2097_v1, %v2097_v1  ;;  %s1951_s18 = smov 15   ;;  %s1952_s15 = smov 17  }
  0x2b   : > { %v2111_v6 = vld [vmem:[%s2087_s16 + $0x58] sm:$0xff]  ;;  %v334_v7 = vadd.f32 %v2105_v4, %v2100_v2  ;;  %v352_v11 = vmul.f32 %v2100_v2, %v2100_v2  ;;  %v353_v12 = vmul.f32 %v2105_v4, %v2105_v4  ;;  %v350_v13 = vmul.f32 %v2108_v5, %v2108_v5  ;;  %v2130_v18 = vld [vmem:[%s2087_s16 + $0x40] sm:$0xff]  ;;  %v2133_v19 = vld [vmem:[%s2087_s16 + $0x48] sm:$0xff]  ;;  %s1954_s21 = smov 16   ;;  %s1955_s23 = smov 112  }
  0x2c   : > { %v331_v8 = vadd.f32 %v2111_v6, %v2108_v5  ;;  %338 = vadd.xlane.f32.xlu0 %v337_v3  ;;  %v351_v14 = vmul.f32 %v2111_v6, %v2111_v6  ;;  %v377_v15 = vadd.f32 %v355_v10, %v354_v9  ;;  %v348_v20 = vmul.f32 %v2130_v18, %v2130_v18  ;;  %v2140_v22 = vld [vmem:[%s2087_s16 + $0x30] sm:$0xff]  ;;  %v2143_v23 = vld [vmem:[%s2087_s16 + $0x38] sm:$0xff]  ;;  %v2154_v29 = vld [vmem:[%s2087_s16 + $0x20] sm:$0xff]  ;;  %s1897_s17 = scalar_lea.hbm %s3161_s7, 16 }
  0x2d   : > { %335 = vadd.xlane.f32.xlu1 %v334_v7  ;;  %v374_v16 = vadd.f32 %v353_v12, %v352_v11  ;;  %v349_v21 = vmul.f32 %v2133_v19, %v2133_v19  ;;  %v328_v24 = vadd.f32 %v2133_v19, %v2130_v18  ;;  %v325_v26 = vadd.f32 %v2143_v23, %v2140_v22  ;;  %v2157_v30 = vld [vmem:[%s2087_s16 + $0x28] sm:$0xff]  ;;  %v302_v36 = vld [vmem:[%s2087_s16 + $0x10] sm:$0xff]  ;;  %v303_v37 = vld [vmem:[%s2087_s16 + $0x18] sm:$0xff] }
  0x2e   : > { %332 = vadd.xlane.f32.xlu2 %v331_v8  ;;  %v371_v17 = vadd.f32 %v351_v14, %v350_v13  ;;  %v346_v27 = vmul.f32 %v2140_v22, %v2140_v22  ;;  %v347_v28 = vmul.f32 %v2143_v23, %v2143_v23  ;;  %v344_v31 = vmul.f32 %v2154_v29, %v2154_v29  ;;  %v2168_v41 = vld [vmem:[%s2087_s16] sm:$0xff]  ;;  %v2171_v42 = vld [vmem:[%s2087_s16 + $0x8] sm:$0xff] }
  0x2f   : > { %v368_v25 = vadd.f32 %v349_v21, %v348_v20  ;;  %v345_v32 = vmul.f32 %v2157_v30, %v2157_v30  ;;  %v322_v34 = vadd.f32 %v2157_v30, %v2154_v29  ;;  %v342_v38 = vmul.f32 %v302_v36, %v302_v36  ;;  %v393_v20 = vld [vmem:[%s3155_s1 + $0x10] sm:$0xff]  ;;  %v394_v21 = vld [vmem:[%s3155_s1 + $0x18] sm:$0xff] }
  0x30   : > { %v365_v33 = vadd.f32 %v347_v28, %v346_v27  ;;  %v343_v39 = vmul.f32 %v303_v37, %v303_v37  ;;  %v319_v40 = vadd.f32 %v303_v37, %v302_v36  ;;  %v316_v44 = vadd.f32 %v2171_v42, %v2168_v41  ;;  %v398_v27 = vld [vmem:[%s3155_s1 + $0x38] sm:$0xff] }
  0x31   : > { %v362_v35 = vadd.f32 %v345_v32, %v344_v31  ;;  %v340_v45 = vmul.f32 %v2168_v41, %v2168_v41  ;;  %v341_v46 = vmul.f32 %v2171_v42, %v2171_v42  ;;  %v381_v52 = vand.u32 127, %v380_v48 }
  0x32   : > { %v359_v43 = vadd.f32 %v343_v39, %v342_v38  ;;  %v615_v39 = vld [vmem:[%s3156_s2 + $0x30] sm:$0xff] }
  0x33   : > { %v356_v47 = vadd.f32 %v341_v46, %v340_v45  ;;  %vm382_vm0 = vcmp.eq.s32.totalorder %v381_v52, 0  ;;  %v614_v46 = vld [vmem:[%s3156_s2 + $0x28] sm:$0xff]  ;;  %v612_v52 = vld [vmem:[%s3156_s2 + $0x18] sm:$0xff] }
  0x34   : > { %378 = vadd.xlane.f32.xlu0 %v377_v15  ;;  %v391_v15 = vld [vmem:[%s3155_s1] sm:$0xff] }
  0x35   : > { %375 = vadd.xlane.f32.xlu1 %v374_v16 }
  0x36   : > { %372 = vadd.xlane.f32.xlu2 %v371_v17  ;;  %v392_v17 = vld [vmem:[%s3155_s1 + $0x8] sm:$0xff] }
  0x3c   : > { %329 = vadd.xlane.f32.xlu0 %v328_v24  ;;  %v395_v24 = vld [vmem:[%s3155_s1 + $0x20] sm:$0xff] }
  0x3d   : > { %369 = vadd.xlane.f32.xlu1 %v368_v25  ;;  %v396_v25 = vld [vmem:[%s3155_s1 + $0x28] sm:$0xff] }
  0x3e   : > { %326 = vadd.xlane.f32.xlu2 %v325_v26  ;;  %v397_v26 = vld [vmem:[%s3155_s1 + $0x30] sm:$0xff] }
  0x44   : > { %366 = vadd.xlane.f32.xlu0 %v365_v33 }
  0x45   : > { %323 = vadd.xlane.f32.xlu1 %v322_v34 }
  0x46   : > { %363 = vadd.xlane.f32.xlu2 %v362_v35 }
  0x4c   : > { %320 = vadd.xlane.f32.xlu0 %v319_v40 }
  0x4d   : > { %360 = vadd.xlane.f32.xlu1 %v359_v43 }
  0x4e   : > { %317 = vadd.xlane.f32.xlu2 %v316_v44 }
  0x54   : > { %357 = vadd.xlane.f32.xlu0 %v356_v47 }
  0x9f   : > { %v339_v49 = vpop.xlane.xlu0 %338 }
  0xa0   : > { %v336_v50 = vpop.xlane.xlu1 %335 }
  0xa1   : > { %v333_v51 = vpop.xlane.xlu2 %332 }
  0xa7   : > { %v379_v53 = vpop.xlane.xlu0 %378 }
  0xa8   : > { %v376_v54 = vpop.xlane.xlu1 %375  ;;  %v390_v56 = vsel %vm382_vm0, %v339_v49, %v379_v53  ;;  %v609_v49 = vld [vmem:[%s3156_s2] sm:$0xff]  ;;  %v616_v53 = vld [vmem:[%s3156_s2 + $0x38] sm:$0xff] }
  0xa9   : > { %v373_v55 = vpop.xlane.xlu2 %372  ;;  %432 = vmatpush.msra.mxu0 %v390_v56  ;;  %v389_v57 = vsel %vm382_vm0, %v336_v50, %v376_v54  ;;  %v613_v50 = vld [vmem:[%s3156_s2 + $0x20] sm:$0xff]  ;;  %v611_v54 = vld [vmem:[%s3156_s2 + $0x10] sm:$0xff] }
  0xaa   : > { %v388_v58 = vsel %vm382_vm0, %v333_v51, %v373_v55  ;;  %v610_v55 = vld [vmem:[%s3156_s2 + $0x8] sm:$0xff] }
  0xab   : > { %433 = vmatpush.msra.mxu0 %v389_v57 }
  0xad   : > { %434 = vmatpush.msra.mxu0 %v388_v58 }
  0xaf   : > { %v330_v59 = vpop.xlane.xlu0 %329 }
  0xb0   : > { %v370_v60 = vpop.xlane.xlu1 %369 }
  0xb1   : > { %v327_v61 = vpop.xlane.xlu2 %326  ;;  %v387_v62 = vsel %vm382_vm0, %v330_v59, %v370_v60 }
  0xb2   : > { %435 = vmatpush.msra.mxu0 %v387_v62 }
  0xb7   : > { %v367_v63 = vpop.xlane.xlu0 %366 }
  0xb8   : > { %v324_v3 = vpop.xlane.xlu1 %323  ;;  %v386_v7 = vsel %vm382_vm0, %v327_v61, %v367_v63 }
  0xb9   : > { %v364_v8 = vpop.xlane.xlu2 %363  ;;  %436 = vmatpush.msra.mxu0 %v386_v7 }
  0xba   : > { %v385_v9 = vsel %vm382_vm0, %v324_v3, %v364_v8 }
  0xbb   : > { %437 = vmatpush.msra.mxu0 %v385_v9 }
  0xbf   : > { %v321_v10 = vpop.xlane.xlu0 %320 }
  0xc0   : > { %v361_v11 = vpop.xlane.xlu1 %360 }
  0xc1   : > { %v384_v12 = vsel %vm382_vm0, %v321_v10, %v361_v11  ;;  %v318_v13 = vpop.xlane.xlu2 %317 }
  0xc2   : > { %438 = vmatpush.msra.mxu0 %v384_v12 }
  0xc7   : > { %v358_v14 = vpop.xlane.xlu0 %357 }
  0xc8   : > { %v383_v16 = vsel %vm382_vm0, %v318_v13, %v358_v14 }
  0xc9   : > { %439 = vmatpush.msra.mxu0 %v383_v16 }
  0xca   : > { %1622 = vmatmul.msk.f32.vlgmr.msra.gmra.mxu0 %vm3162_vm1, %v391_v15 }
  0xd2   : > { %1623 = vmatmul.msk.f32.gmra.mxu0 %vm3162_vm1, %v392_v17 }
  0xda   : > { %1624 = vmatmul.msk.f32.gmra.mxu0 %vm3162_vm1, %v393_v20 }
  0xe2   : > { %1625 = vmatmul.msk.f32.gmra.mxu0 %vm3162_vm1, %v394_v21 }
  0xea   : > { %1626 = vmatmul.msk.f32.gmra.mxu0 %vm3162_vm1, %v395_v24 }
  0xf2   : > { %1627 = vmatmul.msk.f32.gmra.mxu0 %vm3162_vm1, %v396_v25 }
  0xfa   : > { %1628 = vmatmul.msk.f32.gmra.mxu0 %vm3162_vm1, %v397_v26 }
 0x102   : > { %1629 = vmatmul.msk.f32.gmra.mxu0 %vm3162_vm1, %v398_v27 }
 0x147   : > { %v2219_v28 = vpop.f32.mrf.mxu0 }
 0x148   : > { %v465_v51 = vmul.f32 %v2219_v28, %v2219_v28 }
 0x14f   : > { %v2221_v31 = vpop.f32.mrf.mxu0 }
 0x150   : > { %v466_v47 = vmul.f32 %v2221_v31, %v2221_v31 }
 0x157   : > { %v2223_v32 = vpop.f32.mrf.mxu0 }
 0x158   : > { %v467_v44 = vmul.f32 %v2223_v32, %v2223_v32 }
 0x15f   : > { %v2225_v33 = vpop.f32.mrf.mxu0 }
 0x160   : > { %v468_v37 = vmul.f32 %v2225_v33, %v2225_v33 }
 0x167   : > { %v2227_v34 = vpop.f32.mrf.mxu0 }
 0x168   : > { %v469_v35 = vmul.f32 %v2227_v34, %v2227_v34 }
 0x16a   : > { %489 = vrot.lane.b32.xlu0 %v469_v35, %s1947_s29 }
 0x16f   : > { %v2232_v36 = vpop.f32.mrf.mxu0 }
 0x170   : > { %v470_v48 = vmul.f32 %v2232_v36, %v2232_v36 }
 0x172   : > { %487 = vrot.lane.b32.xlu0 %v468_v37, %s1947_s29 }
 0x177   : > { %v2237_v38 = vpop.f32.mrf.mxu0 }
 0x178   : > { %v471_v40 = vmul.f32 %v2237_v38, %v2237_v38 }
 0x17a   : > { %493 = vrot.lane.b32.xlu1 %v471_v40, %s1947_s29  ;;  %637 = vrot.lane.b32.xlu0 %v615_v39, %s1947_s29 }
 0x17f   : > { %v2246_v43 = vpop.f32.mrf.mxu0 }
 0x180   : > { %v472_v45 = vmul.f32 %v2246_v43, %v2246_v43 }
 0x182   : > { %485 = vrot.lane.b32.xlu1 %v467_v44, %s1947_s29  ;;  %495 = vrot.lane.b32.xlu2 %v472_v45, %s1947_s29 }
 0x183   : > { %635 = vrot.lane.b32.xlu0 %v614_v46, %s1947_s29 }
 0x18a   : > { %483 = vrot.lane.b32.xlu1 %v466_v47, %s1947_s29  ;;  %491 = vrot.lane.b32.xlu2 %v470_v48, %s1947_s29 }
 0x18b   : > { %625 = vrot.lane.b32.xlu0 %v609_v49, %s1947_s29 }
 0x192   : > { %633 = vrot.lane.b32.xlu1 %v613_v50, %s1947_s29  ;;  %481 = vrot.lane.b32.xlu2 %v465_v51, %s1947_s29 }
 0x19a   : > { %631 = vrot.lane.b32.xlu1 %v612_v52, %s1947_s29  ;;  %639 = vrot.lane.b32.xlu2 %v616_v53, %s1947_s29 }
 0x1a2   : > { %629 = vrot.lane.b32.xlu2 %v611_v54, %s1947_s29 }
 0x1aa   : > { %627 = vrot.lane.b32.xlu2 %v610_v55, %s1947_s29 }
 0x1dc   : > { %v490_v56 = vpop.permute.xlu0 %489  ;;  %v496_v57 = vpop.permute.xlu2 %495 }
 0x1dd   : > { %v509_v58 = vsub.f32 %v2227_v34, %v490_v56  ;;  %v512_v59 = vsub.f32 %v2246_v43, %v496_v57 }
 0x1df   : > { %v517_v60 = vmax.f32 %v509_v58, 0.0  ;;  %v520_v61 = vmax.f32 %v512_v59, 0.0  ;;  %v1948_v59 = vmov 1  }
 0x1e0   : > { %1757 = vset.pattern.permute.xlu1 %v1948_v59  ;;  %1756 = vset.pattern.permute.xlu2 %v1948_v59 }
 0x1e1   : > { %v528_v62 = vadd.f32 1e-05, %v520_v61  ;;  %v2293_v63 = vadd.f32 1e-05, %v517_v60 }
 0x1e3   : > { %1765 = vrsqrt.f32 %v528_v62  ;;  %vm605_vm3 = vweird.f32 %v528_v62  ;;  %vm575_vm10 = vweird.f32 %v2293_v63 }
 0x1e4   : > { %v488_v3 = vpop.permute.xlu0 %487  ;;  %v492_v7 = vpop.permute.xlu2 %491  ;;  %1767 = vrsqrt.f32 %v2293_v63 }
 0x1e5   : > { %v508_v8 = vsub.f32 %v2225_v33, %v488_v3  ;;  %v510_v9 = vsub.f32 %v2232_v36, %v492_v7 }
 0x1e7   : > { %v516_v10 = vmax.f32 %v508_v8, 0.0  ;;  %v518_v11 = vmax.f32 %v510_v9, 0.0 }
 0x1e9   : > { %v526_v12 = vadd.f32 1e-05, %v518_v11  ;;  %v1766_v13 = vpop.eup %1765  ;;  %v2298_v15 = vadd.f32 1e-05, %v516_v10 }
 0x1ea   : > { %v600_v14 = vmul.f32 %v1766_v13, %v528_v62  ;;  %v2300_v20 = vpop.eup %1767  ;;  %vm606_vm2 = vweird.f32 %v1766_v13 }
 0x1eb   : > { %1769 = vrsqrt.f32 %v526_v12  ;;  %v570_v37 = vmul.f32 %v2300_v20, %v2293_v63  ;;  %vm607_vm4 = vmor %vm605_vm3, %vm606_vm2  ;;  %vm585_vm6 = vweird.f32 %v526_v12  ;;  %vm576_vm8 = vweird.f32 %v2300_v20 }
 0x1ec   : > { %v494_v16 = vpop.permute.xlu1 %493  ;;  %v482_v17 = vpop.permute.xlu2 %481  ;;  %v601_v21 = vmul.f32 %v1766_v13, %v600_v14  ;;  %1771 = vrsqrt.f32 %v2298_v15  ;;  %vm577_vm12 = vmor %vm575_vm10, %vm576_vm8  ;;  %vm565_vm0 = vweird.f32 %v2298_v15 }
 0x1ed   : > { %v511_v24 = vsub.f32 %v2237_v38, %v494_v16  ;;  %v505_v25 = vsub.f32 %v2219_v28, %v482_v17  ;;  %v2311_v44 = vpop.permute.xlu0 %637  ;;  %v571_v49 = vmul.f32 %v2300_v20, %v570_v37 }
 0x1ee   : > { %v602_v35 = vmul.f32 0.5, %v601_v21 }
 0x1ef   : > { %v519_v26 = vmax.f32 %v511_v24, 0.0  ;;  %v513_v27 = vmax.f32 %v505_v25, 0.0  ;;  %v572_v61 = vmul.f32 0.5, %v571_v49 }
 0x1f0   : > { %v603_v45 = vsub.f32 1.5, %v602_v35 }
 0x1f1   : > { %v2307_v39 = vadd.f32 1e-05, %v519_v26  ;;  %v2309_v40 = vadd.f32 1e-05, %v513_v27  ;;  %v1770_v46 = vpop.eup %1769  ;;  %v573_v21 = vsub.f32 1.5, %v572_v61 }
 0x1f2   : > { %v580_v47 = vmul.f32 %v1770_v46, %v526_v12  ;;  %v604_v48 = vmul.f32 %v1766_v13, %v603_v45  ;;  %v2316_v52 = vpop.eup %1771  ;;  %vm586_vm5 = vweird.f32 %v1770_v46 }
 0x1f3   : > { %1773 = vrsqrt.f32 %v2307_v39  ;;  %v560_v60 = vmul.f32 %v2316_v52, %v2298_v15  ;;  %vm587_vm7 = vmor %vm585_vm6, %vm586_vm5  ;;  %v574_v12 = vmul.f32 %v2300_v20, %v573_v21  ;;  %vm595_vm11 = vweird.f32 %v2307_v39 }
 0x1f4   : > { %1775 = vrsqrt.f32 %v2309_v40  ;;  %v486_v50 = vpop.permute.xlu1 %485  ;;  %v640_v51 = vpop.permute.xlu2 %639  ;;  %v581_v53 = vmul.f32 %v1770_v46, %v580_v47  ;;  %v608_v55 = vsel %vm607_vm4, %v1766_v13, %v604_v48  ;;  %vm566_vm14 = vweird.f32 %v2316_v52 }
 0x1f5   : > { %v507_v54 = vsub.f32 %v2223_v32, %v486_v50  ;;  %v2319_v56 = vmul.f32 %v640_v51, %v608_v55  ;;  %v636_v11 = vpop.permute.xlu0 %635  ;;  %v561_v14 = vmul.f32 %v2316_v52, %v560_v60  ;;  %vm535_vm3 = vweird.f32 %v2309_v40  ;;  %vm567_vm4 = vmor %vm565_vm0, %vm566_vm14 }
 0x1f6   : > { %v582_v58 = vmul.f32 0.5, %v581_v53 }
 0x1f7   : > { %v515_v57 = vmax.f32 %v507_v54, 0.0  ;;  %687 = vrot.lane.b32.xlu0 %v2319_v56, %s1949_s19  ;;  %v562_v48 = vmul.f32 0.5, %v561_v14 }
 0x1f8   : > { %v583_v7 = vsub.f32 1.5, %v582_v58 }
 0x1f9   : > { %v1774_v62 = vpop.eup %1773  ;;  %v2327_v3 = vadd.f32 1e-05, %v515_v57  ;;  %v578_v57 = vsel %vm577_vm12, %v2300_v20, %v574_v12  ;;  %v563_v60 = vsub.f32 1.5, %v562_v48 }
 0x1fa   : > { %v2329_v8 = vpop.eup %1775  ;;  %v590_v9 = vmul.f32 %v1774_v62, %v2307_v39  ;;  %v584_v13 = vmul.f32 %v1770_v46, %v583_v7  ;;  %vm596_vm9 = vweird.f32 %v1774_v62 }
 0x1fb   : > { %v530_v10 = vmul.f32 %v2329_v8, %v2309_v40  ;;  %1777 = vrsqrt.f32 %v2327_v3  ;;  %vm597_vm13 = vmor %vm595_vm11, %vm596_vm9  ;;  %vm536_vm15 = vweird.f32 %v2329_v8  ;;  %vm555_vm6 = vweird.f32 %v2327_v3 }
 0x1fc   : > { %v591_v16 = vmul.f32 %v1774_v62, %v590_v9  ;;  %v484_v17 = vpop.permute.xlu1 %483  ;;  %v588_v25 = vsel %vm587_vm7, %v1770_v46, %v584_v13  ;;  %v630_v9 = vpop.permute.xlu2 %629  ;;  %vm537_vm5 = vmor %vm535_vm3, %vm536_vm15 }
 0x1fd   : > { %v531_v24 = vmul.f32 %v2329_v8, %v530_v10  ;;  %v506_v26 = vsub.f32 %v2221_v31, %v484_v17  ;;  %v2338_v35 = vmul.f32 %v636_v11, %v588_v25  ;;  %v626_v13 = vpop.permute.xlu0 %625 }
 0x1fe   : > { %v592_v27 = vmul.f32 0.5, %v591_v16 }
 0x1ff   : > { %v514_v37 = vmax.f32 %v506_v26, 0.0  ;;  %v532_v45 = vmul.f32 0.5, %v531_v24  ;;  %683 = vrot.lane.b32.xlu1 %v2338_v35, %s1949_s19 }
 0x200   : > { %v593_v47 = vsub.f32 1.5, %v592_v27 }
 0x201   : > { %v1778_v49 = vpop.eup %1777  ;;  %v522_v50 = vadd.f32 1e-05, %v514_v37  ;;  %v533_v53 = vsub.f32 1.5, %v532_v45  ;;  %v3163_v45 = vmov 0  }
 0x202   : > { %v594_v46 = vmul.f32 %v1774_v62, %v593_v47  ;;  %v550_v51 = vmul.f32 %v1778_v49, %v2327_v3  ;;  %vm556_vm2 = vweird.f32 %v1778_v49  ;;  %1758 = vset.pattern.permute.xlu0 %v3163_v45  ;;  %v661_v47 = vld [vmem:[%s3157_s3 + $0x20] sm:$0xff] }
 0x203   : > { %1779 = vrsqrt.f32 %v522_v50  ;;  %v534_v39 = vmul.f32 %v2329_v8, %v533_v53  ;;  %vm557_vm7 = vmor %vm555_vm6, %vm556_vm2  ;;  %vm545_vm9 = vweird.f32 %v522_v50 }
 0x204   : > { %v598_v54 = vsel %vm597_vm13, %v1774_v62, %v594_v46  ;;  %v551_v55 = vmul.f32 %v1778_v49, %v550_v51  ;;  %v634_v58 = vpop.permute.xlu1 %633  ;;  %v564_v62 = vmul.f32 %v2316_v52, %v563_v60  ;;  %v657_v60 = vld [vmem:[%s3157_s3] sm:$0xff] }
 0x205   : > { %v655_v61 = vmul.f32 %v2311_v44, %v598_v54  ;;  %v653_v7 = vmul.f32 %v634_v58, %v578_v57  ;;  %v538_v14 = vsel %vm537_vm5, %v2329_v8, %v534_v39  ;;  %v628_v8 = vpop.permute.xlu2 %627 }
 0x206   : > { %v552_v63 = vmul.f32 0.5, %v551_v55  ;;  %v568_v17 = vsel %vm567_vm4, %v2316_v52, %v564_v62  ;;  %v649_v26 = vmul.f32 %v626_v13, %v538_v14 }
 0x207   : > { %681 = vrot.lane.b32.xlu2 %v653_v7, %s1949_s19  ;;  %685 = vrot.lane.b32.xlu1 %v655_v61, %s1949_s19 }
 0x208   : > { %v553_v20 = vsub.f32 1.5, %v552_v63 }
 0x209   : > { %v1780_v44 = vpop.eup %1779 }
 0x20a   : > { %v540_v10 = vmul.f32 %v1780_v44, %v522_v50  ;;  %v554_v11 = vmul.f32 %v1778_v49, %v553_v20  ;;  %vm546_vm8 = vweird.f32 %v1780_v44  ;;  %v662_v20 = vld [vmem:[%s3157_s3 + $0x28] sm:$0xff] }
 0x20b   : > { %vm547_vm10 = vmor %vm545_vm9, %vm546_vm8 }
 0x20c   : > { %v541_v16 = vmul.f32 %v1780_v44, %v540_v10  ;;  %v632_v15 = vpop.permute.xlu1 %631  ;;  %v558_v21 = vsel %vm557_vm7, %v1778_v49, %v554_v11 }
 0x20d   : > { %v652_v24 = vmul.f32 %v632_v15, %v568_v17  ;;  %v651_v25 = vmul.f32 %v630_v9, %v558_v21  ;;  %v658_v9 = vld [vmem:[%s3157_s3 + $0x8] sm:$0xff] }
 0x20e   : > { %v542_v27 = vmul.f32 0.5, %v541_v16 }
 0x20f   : > { %679 = vrot.lane.b32.xlu2 %v652_v24, %s1949_s19  ;;  %677 = vrot.lane.b32.xlu0 %v651_v25, %s1949_s19 }
 0x210   : > { %673 = vrot.lane.b32.xlu1 %v649_v26, %s1949_s19  ;;  %v543_v40 = vsub.f32 1.5, %v542_v27 }
 0x212   : > { %v544_v3 = vmul.f32 %v1780_v44, %v543_v40 }
 0x214   : > { %v548_v37 = vsel %vm547_vm10, %v1780_v44, %v544_v3 }
 0x215   : > { %v650_v52 = vmul.f32 %v628_v8, %v548_v37 }
 0x217   : > { %738 = vperm.xlu2 %1756, %v655_v61   ;;  %675 = vrot.lane.b32.xlu0 %v650_v52, %s1949_s19 }
 0x218   : > { %730 = vperm.xlu1 %1757, %v653_v7  }
 0x21f   : > { %734 = vperm.xlu2 %1756, %v2338_v35  }
 0x220   : > { %726 = vperm.xlu1 %1757, %v652_v24  }
 0x227   : > { %722 = vperm.xlu2 %1756, %v651_v25  }
 0x228   : > { %742 = vperm.xlu1 %1757, %v2319_v56   ;;  %v664_v56 = vld [vmem:[%s3157_s3 + $0x38] sm:$0xff] }
 0x22f   : > { %1760 = vset.pattern.permute.xlu2 %v3163_v45 }
 0x230   : > { %1759 = vset.pattern.permute.xlu1 %v3163_v45 }
 0x261   : > { %v682_v12 = vpop.permute.xlu2 %681 }
 0x262   : > { %v701_v48 = vmul.f32 %v682_v12, %v2227_v34  ;;  %v660_v34 = vld [vmem:[%s3157_s3 + $0x18] sm:$0xff] }
 0x264   : > { %v709_v49 = vsub.f32 %v661_v47, %v701_v48 }
 0x266   : > { %783 = vperm.xlu1 %1759, %v709_v49  }
 0x269   : > { %v688_v35 = vpop.permute.xlu0 %687  ;;  %v680_v51 = vpop.permute.xlu2 %679 }
 0x26a   : > { %v704_v50 = vmul.f32 %v688_v35, %v2246_v43  ;;  %v700_v53 = vmul.f32 %v680_v51, %v2225_v33  ;;  %v659_v43 = vld [vmem:[%s3157_s3 + $0x10] sm:$0xff] }
 0x26c   : > { %v712_v46 = vsub.f32 %v664_v56, %v704_v50  ;;  %v708_v55 = vsub.f32 %v660_v34, %v700_v53 }
 0x26e   : > { %1761 = vset.pattern.permute.xlu1 %v1948_v59  ;;  %798 = vperm.xlu2 %1760, %v712_v46  }
 0x26f   : > { %714 = vperm.xlu1 %1761, %v649_v26  }
 0x271   : > { %v684_v54 = vpop.permute.xlu1 %683  ;;  %v2405_v14 = vpop.permute.xlu2 %738 }
 0x272   : > { %v702_v62 = vmul.f32 %v684_v54, %v2232_v36  ;;  %v663_v36 = vld [vmem:[%s3157_s3 + $0x30] sm:$0xff] }
 0x276   : > { %778 = vperm.xlu2 %1760, %v708_v55  }
 0x277   : > { %1763 = vset.pattern.permute.xlu1 %v3163_v45 }
 0x279   : > { %v686_v57 = vpop.permute.xlu1 %685  ;;  %v2407_v16 = vpop.permute.xlu2 %734 }
 0x281   : > { %v678_v58 = vpop.permute.xlu0 %677  ;;  %v2409_v15 = vpop.permute.xlu2 %722 }
 0x282   : > { %v674_v33 = vpop.permute.xlu1 %673  ;;  %v699_v61 = vmul.f32 %v678_v58, %v2223_v32  ;;  %v710_v32 = vsub.f32 %v662_v20, %v702_v62 }
 0x283   : > { %v697_v7 = vmul.f32 %v674_v33, %v2219_v28  ;;  %v703_v28 = vmul.f32 %v686_v57, %v2237_v38 }
 0x284   : > { %v707_v63 = vsub.f32 %v659_v43, %v699_v61 }
 0x285   : > { %v705_v39 = vsub.f32 %v657_v60, %v697_v7  ;;  %v711_v13 = vsub.f32 %v663_v36, %v703_v28  ;;  %v2473_v36 = vmul.f32 %v2405_v14, %v2100_v2 }
 0x286   : > { %773 = vperm.xlu0 %1758, %v707_v63  }
 0x287   : > { %763 = vperm.xlu2 %1760, %v705_v39  }
 0x289   : > { %v676_v44 = vpop.permute.xlu0 %675 }
 0x28a   : > { %v698_v10 = vmul.f32 %v676_v44, %v2221_v31  ;;  %v731_v31 = vpop.permute.xlu1 %730 }
 0x28b   : > { %v754_v35 = vmul.f32 %v731_v31, %v2133_v19 }
 0x28c   : > { %v706_v11 = vsub.f32 %v658_v9, %v698_v10 }
 0x28e   : > { %788 = vperm.xlu0 %1758, %v710_v32   ;;  %768 = vperm.xlu1 %1763, %v706_v11  }
 0x292   : > { %v727_v17 = vpop.permute.xlu1 %726 }
 0x293   : > { %v751_v37 = vmul.f32 %v727_v17, %v2140_v22 }
 0x296   : > { %793 = vperm.xlu0 %1758, %v711_v13   ;;  %v2477_v13 = vmul.f32 %v2405_v14, %v2105_v4 }
 0x29a   : > { %v743_v38 = vpop.permute.xlu1 %742 }
 0x29b   : > { %v759_v24 = vmul.f32 %v743_v38, %v2094_v0  ;;  %v760_v25 = vmul.f32 %v743_v38, %v2097_v1  ;;  %v753_v1 = vmul.f32 %v731_v31, %v2130_v18  ;;  %v755_v31 = vmul.f32 %v2407_v16, %v2108_v5 }
 0x29c   : > { %v749_v38 = vmul.f32 %v2409_v15, %v2154_v29 }
 0x29e   : > { %1762 = vset.pattern.permute.xlu0 %v1948_v59 }
 0x29f   : > { %718 = vperm.xlu0 %1762, %v650_v52   ;;  %v752_v52 = vmul.f32 %v727_v17, %v2143_v23 }
 0x2a7   : > { %1764 = vset.pattern.permute.xlu0 %v3163_v45 }
 0x2c8   : > { %v799_v21 = vpop.permute.xlu2 %798 }
 0x2c9   : > { %v2413_v26 = vadd.f32 %v799_v21, %v759_v24  ;;  %v2415_v59 = vadd.f32 %v799_v21, %v760_v25  ;;  %v750_v21 = vmul.f32 %v2409_v15, %v2157_v30 }
 0x2cb   : > { %v1644_v27 = vmul.f32 -1.442695, %v2413_v26  ;;  %v1645_v40 = vmul.f32 -1.442695, %v2415_v59 }
 0x2cd   : > { %1781 = vpow2.f32 %v1644_v27 }
 0x2ce   : > { %1783 = vpow2.f32 %v1645_v40 }
 0x2d0   : > { %v779_v3 = vpop.permute.xlu2 %778 }
 0x2d1   : > { %v2421_v47 = vadd.f32 %v779_v3, %v751_v37  ;;  %v2424_v12 = vadd.f32 %v779_v3, %v752_v52 }
 0x2d3   : > { %v1782_v0 = vpop.eup %1781  ;;  %v1636_v49 = vmul.f32 -1.442695, %v2421_v47  ;;  %v1637_v22 = vmul.f32 -1.442695, %v2424_v12 }
 0x2d4   : > { %v1784_v48 = vpop.eup %1783  ;;  %v2430_v50 = vadd.f32 1.0, %v1782_v0 }
 0x2d5   : > { %v2433_v46 = vadd.f32 1.0, %v1784_v48  ;;  %1785 = vpow2.f32 %v1636_v49  ;;  %v756_v49 = vmul.f32 %v2407_v16, %v2111_v6 }
 0x2d6   : > { %1787 = vrcp.f32 %v2430_v50  ;;  %vm1096_vm11 = vweird.f32 %v2430_v50  ;;  %v1100_v4 = vand.u32 2147483647, %v2430_v50  ;;  %v1102_v5 = vand.u32 2147483648, %v2430_v50 }
 0x2d7   : > { %1789 = vpow2.f32 %v1637_v22  ;;  %v1115_v14 = vand.u32 2147483647, %v2433_v46  ;;  %v1117_v3 = vand.u32 2147483648, %v2433_v46  ;;  %vm1111_vm0 = vweird.f32 %v2433_v46 }
 0x2d8   : > { %v784_v8 = vpop.permute.xlu1 %783  ;;  %1791 = vrcp.f32 %v2433_v46  ;;  %vm2520_vm15 = vcmp.eq.f32.partialorder %v1100_v4, 8.507059e+37  ;;  %v1103_v16 = vor.u32 1.1754944e-38, %v1102_v5 }
 0x2d9   : > { %v2427_v56 = vadd.f32 %v784_v8, %v753_v1  ;;  %v2435_v23 = vadd.f32 %v784_v8, %v754_v35  ;;  %vm2531_vm2 = vcmp.eq.f32.partialorder %v1115_v14, 8.507059e+37 }
 0x2db   : > { %v1638_v18 = vmul.f32 -1.442695, %v2427_v56  ;;  %v1639_v19 = vmul.f32 -1.442695, %v2435_v23  ;;  %v1786_v54 = vpop.eup %1785 }
 0x2dc   : > { %v2445_v43 = vpop.eup %1787  ;;  %v2449_v33 = vadd.f32 1.0, %v1786_v54 }
 0x2dd   : > { %1793 = vpow2.f32 %v1638_v18  ;;  %v1790_v58 = vpop.eup %1789  ;;  %v1092_v63 = vmul.f32 %v2445_v43, %v2430_v50  ;;  %vm1097_vm12 = vweird.f32 %v2445_v43 }
 0x2de   : > { %1795 = vpow2.f32 %v1639_v19  ;;  %v2447_v60 = vpop.eup %1791  ;;  %v2456_v39 = vadd.f32 1.0, %v1790_v58  ;;  %vm2516_vm14 = vmor %vm1096_vm11, %vm1097_vm12  ;;  %vm976_vm4 = vweird.f32 %v2449_v33 }
 0x2df   : > { %1797 = vrcp.f32 %v2449_v33  ;;  %v1093_v44 = vsub.f32 1.0, %v1092_v63  ;;  %vm1112_vm13 = vweird.f32 %v2447_v60 }
 0x2e0   : > { %vm2540_vm3 = vmor %vm1111_vm0, %vm1112_vm13  ;;  %vm991_vm5 = vweird.f32 %v2456_v39 }
 0x2e1   : > { %v715_v51 = vpop.permute.xlu1 %714  ;;  %v764_v34 = vpop.permute.xlu2 %763  ;;  %v1094_v11 = vmul.f32 %v2445_v43, %v1093_v44 }
 0x2e2   : > { %v745_v53 = vmul.f32 %v715_v51, %v2168_v41  ;;  %v746_v55 = vmul.f32 %v715_v51, %v2171_v42  ;;  %v1107_v42 = vmul.f32 %v2447_v60, %v2433_v46  ;;  %v982_v51 = vand.u32 2147483648, %v2449_v33 }
 0x2e3   : > { %v1794_v41 = vpop.eup %1793  ;;  %v1095_v30 = vadd.f32 %v2445_v43, %v1094_v11 }
 0x2e4   : > { %v2443_v57 = vadd.f32 %v764_v34, %v745_v53  ;;  %v2451_v61 = vadd.f32 %v764_v34, %v746_v55  ;;  %v1796_v62 = vpop.eup %1795  ;;  %v2461_v20 = vadd.f32 1.0, %v1794_v41  ;;  %v1108_v32 = vsub.f32 1.0, %v1107_v42 }
 0x2e5   : > { %v2465_v10 = vadd.f32 1.0, %v1796_v62  ;;  %v2469_v28 = vpop.eup %1797  ;;  %v1099_v6 = vsel %vm2516_vm14, %v2445_v43, %v1095_v30  ;;  %v1118_v55 = vor.u32 1.1754944e-38, %v1117_v3  ;;  %v2553_v63 = vor.u32 1.1754944e-38, %v982_v51 }
 0x2e6   : > { %v1630_v7 = vmul.f32 -1.442695, %v2443_v57  ;;  %v1631_v9 = vmul.f32 -1.442695, %v2451_v61  ;;  %v1109_v24 = vmul.f32 %v2447_v60, %v1108_v32  ;;  %v972_v8 = vmul.f32 %v2469_v28, %v2449_v33 }
 0x2e7   : > { %vm1006_vm7 = vweird.f32 %v2461_v20  ;;  %vm1021_vm8 = vweird.f32 %v2465_v10  ;;  %vm977_vm9 = vweird.f32 %v2469_v28 }
 0x2e8   : > { %1799 = vpow2.f32 %v1630_v7  ;;  %v1110_v1 = vadd.f32 %v2447_v60, %v1109_v24  ;;  %v973_v34 = vsub.f32 1.0, %v972_v8  ;;  %v980_v7 = vand.u32 2147483647, %v2449_v33  ;;  %vm2619_vm13 = vmor %vm976_vm4, %vm977_vm9 }
 0x2e9   : > { %1801 = vrcp.f32 %v2456_v39 }
 0x2ea   : > { %1803 = vrcp.f32 %v2461_v20  ;;  %v1114_v54 = vsel %vm2540_vm3, %v2447_v60, %v1110_v1  ;;  %v974_v32 = vmul.f32 %v2469_v28, %v973_v34  ;;  %vm2578_vm6 = vcmp.eq.f32.partialorder %v980_v7, 8.507059e+37 }
 0x2eb   : > { %1805 = vpow2.f32 %v1631_v9  ;;  %v1104_v9 = vsel %vm2520_vm15, %v1103_v16, %v1099_v6  ;;  %v1119_v60 = vsel %vm2531_vm2, %v1118_v55, %v1114_v54 }
 0x2ec   : > { %1807 = vrcp.f32 %v2465_v10  ;;  %v2576_v5 = vmul.f32 %v1104_v9, %v2413_v26  ;;  %v2583_v8 = vmul.f32 %v1119_v60, %v2415_v59  ;;  %v1025_v26 = vand.u32 2147483647, %v2465_v10 }
 0x2ed   : > { %v975_v1 = vadd.f32 %v2469_v28, %v974_v32  ;;  %v1027_v59 = vand.u32 2147483648, %v2465_v10 }
 0x2ee   : > { %v1800_v17 = vpop.eup %1799  ;;  %vm2625_vm15 = vcmp.eq.f32.partialorder %v1025_v26, 8.507059e+37 }
 0x2ef   : > { %v2487_v2 = vpop.eup %1801  ;;  %v2501_v40 = vadd.f32 1.0, %v1800_v17  ;;  %v979_v54 = vsel %vm2619_vm13, %v2469_v28, %v975_v1  ;;  %v1846_v1 = vld [vmem:[%s2087_s16 + $0x18] sm:$0xff] }
 0x2f0   : > { %v2499_v15 = vpop.eup %1803  ;;  %v987_v48 = vmul.f32 %v2487_v2, %v2456_v39  ;;  %vm992_vm10 = vweird.f32 %v2487_v2  ;;  %v984_v32 = vsel %vm2578_vm6, %v2553_v63, %v979_v54 }
 0x2f1   : > { %v1806_v37 = vpop.eup %1805  ;;  %v1002_v19 = vmul.f32 %v2499_v15, %v2461_v20  ;;  %vm1007_vm11 = vweird.f32 %v2499_v15  ;;  %vm2636_vm0 = vmor %vm991_vm5, %vm992_vm10  ;;  %vm886_vm4 = vweird.f32 %v2501_v40  ;;  %v2684_v30 = vmul.f32 %v984_v32, %v2421_v47 }
 0x2f2   : > { %v2526_v18 = vpop.eup %1807  ;;  %v2535_v53 = vadd.f32 1.0, %v1806_v37  ;;  %v988_v43 = vsub.f32 1.0, %v987_v48  ;;  %v1010_v37 = vand.u32 2147483647, %v2461_v20  ;;  %vm2662_vm3 = vmor %vm1006_vm7, %vm1007_vm11 }
 0x2f3   : > { %v1017_v41 = vmul.f32 %v2526_v18, %v2465_v10  ;;  %v1003_v44 = vsub.f32 1.0, %v1002_v19  ;;  %vm1022_vm14 = vweird.f32 %v2526_v18 }
 0x2f4   : > { %vm2611_vm12 = vcmp.eq.f32.partialorder %v1010_v37, 8.507059e+37  ;;  %vm2676_vm5 = vmor %vm1021_vm8, %vm1022_vm14 }
 0x2f5   : > { %v1018_v14 = vsub.f32 1.0, %v1017_v41 }
 0x2f7   : > { %v1019_v51 = vmul.f32 %v2526_v18, %v1018_v14 }
 0x2f8   : > { %v774_v25 = vpop.permute.xlu0 %773 }
 0x2f9   : > { %v2493_v27 = vadd.f32 %v774_v25, %v749_v38  ;;  %v2495_v29 = vadd.f32 %v774_v25, %v750_v21  ;;  %v995_v38 = vand.u32 2147483647, %v2456_v39  ;;  %v997_v21 = vand.u32 2147483648, %v2456_v39 }
 0x2fa   : > { %v1020_v9 = vadd.f32 %v2526_v18, %v1019_v51 }
 0x2fb   : > { %v1634_v52 = vmul.f32 -1.442695, %v2493_v27  ;;  %v1635_v0 = vmul.f32 -1.442695, %v2495_v29  ;;  %v998_v55 = vor.u32 1.1754944e-38, %v997_v21  ;;  %vm996_vm2 = vcmp.eq.f32.partialorder %v995_v38, 8.507059e+37 }
 0x2fc   : > { %v1024_v14 = vsel %vm2676_vm5, %v2526_v18, %v1020_v9  ;;  %v1845_v18 = vld [vmem:[%s2087_s16 + $0x10] sm:$0xff]  ;;  %s1953_s16 = smov 113  }
 0x2fd   : > { %1809 = vpow2.f32 %v1634_v52  ;;  %v1012_v52 = vand.u32 2147483648, %v2461_v20 }
 0x2fe   : > { %1811 = vrcp.f32 %v2501_v40 }
 0x2ff   : > { %1813 = vpow2.f32 %v1635_v0  ;;  %v1004_v0 = vmul.f32 %v2499_v15, %v1003_v44  ;;  %v1013_v19 = vor.u32 1.1754944e-38, %v1012_v52 }
 0x300   : > { %v789_v58 = vpop.permute.xlu0 %788  ;;  %1815 = vrcp.f32 %v2535_v53 }
 0x301   : > { %v2555_v42 = vadd.f32 %v789_v58, %v755_v31  ;;  %v2557_v62 = vadd.f32 %v789_v58, %v756_v49  ;;  %v989_v31 = vmul.f32 %v2487_v2, %v988_v43 }
 0x303   : > { %v1810_v11 = vpop.eup %1809  ;;  %v1640_v17 = vmul.f32 -1.442695, %v2555_v42  ;;  %v1641_v4 = vmul.f32 -1.442695, %v2557_v62  ;;  %v990_v48 = vadd.f32 %v2487_v2, %v989_v31  ;;  %v1028_v31 = vor.u32 1.1754944e-38, %v1027_v59 }
 0x304   : > { %v2570_v24 = vpop.eup %1811  ;;  %v2572_v25 = vadd.f32 1.0, %v1810_v11 }
 0x305   : > { %v1814_v3 = vpop.eup %1813  ;;  %1817 = vpow2.f32 %v1640_v17  ;;  %v882_v6 = vmul.f32 %v2570_v24, %v2501_v40  ;;  %v994_v7 = vsel %vm2636_vm0, %v2487_v2, %v990_v48  ;;  %v892_v2 = vand.u32 2147483648, %v2501_v40 }
 0x306   : > { %1819 = vrcp.f32 %v2572_v25  ;;  %v2597_v49 = vpop.eup %1815  ;;  %v2599_v35 = vadd.f32 1.0, %v1814_v3  ;;  %v999_v21 = vsel %vm996_vm2, %v998_v55, %v994_v7  ;;  %v1029_v34 = vsel %vm2625_vm15, %v1028_v31, %v1024_v14 }
 0x307   : > { %1821 = vpow2.f32 %v1641_v4  ;;  %v897_v28 = vmul.f32 %v2597_v49, %v2535_v53  ;;  %v883_v60 = vsub.f32 1.0, %v882_v6  ;;  %v2692_v52 = vmul.f32 %v999_v21, %v2424_v12  ;;  %v769_v6 = vpop.permute.xlu1 %768 }
 0x308   : > { %v794_v22 = vpop.permute.xlu0 %793  ;;  %1823 = vrcp.f32 %v2599_v35  ;;  %vm887_vm6 = vweird.f32 %v2570_v24  ;;  %vm946_vm8 = vweird.f32 %v2572_v25  ;;  %v952_v14 = vand.u32 2147483648, %v2572_v25 }
 0x309   : > { %v2605_v16 = vadd.f32 %v794_v22, %v2473_v36  ;;  %v2608_v50 = vadd.f32 %v794_v22, %v2477_v13  ;;  %v1005_v36 = vadd.f32 %v2499_v15, %v1004_v0  ;;  %v898_v4 = vsub.f32 1.0, %v897_v28  ;;  %vm2740_vm7 = vmor %vm886_vm4, %vm887_vm6 }
 0x30a   : > { %v884_v3 = vmul.f32 %v2570_v24, %v883_v60  ;;  %v2694_v0 = vor.u32 1.1754944e-38, %v892_v2  ;;  %v905_v22 = vand.u32 2147483647, %v2535_v53 }
 0x30b   : > { %v1818_v43 = vpop.eup %1817  ;;  %v1642_v58 = vmul.f32 -1.442695, %v2605_v16  ;;  %v1643_v41 = vmul.f32 -1.442695, %v2608_v50  ;;  %v1009_v38 = vsel %vm2662_vm3, %v2499_v15, %v1005_v36  ;;  %v890_v15 = vand.u32 2147483647, %v2501_v40 }
 0x30c   : > { %v2648_v39 = vadd.f32 1.0, %v1818_v43  ;;  %v2651_v44 = vpop.eup %1819  ;;  %v1014_v48 = vsel %vm2611_vm12, %v1013_v19, %v1009_v38  ;;  %v899_v12 = vmul.f32 %v2597_v49, %v898_v4  ;;  %v907_v36 = vand.u32 2147483648, %v2535_v53 }
 0x30d   : > { %1825 = vpow2.f32 %v1642_v58  ;;  %v1822_v11 = vpop.eup %1821  ;;  %v942_v10 = vmul.f32 %v2651_v44, %v2572_v25  ;;  %v2717_v19 = vadd.f32 %v2570_v24, %v884_v3  ;;  %v2722_v58 = vmul.f32 %v1014_v48, %v2427_v56 }
 0x30e   : > { %1827 = vrcp.f32 %v2648_v39  ;;  %v2667_v63 = vadd.f32 1.0, %v1822_v11  ;;  %v2696_v26 = vpop.eup %1823  ;;  %v2734_v11 = vmul.f32 %v1029_v34, %v2435_v23  ;;  %v2745_v17 = vadd.f32 %v2597_v49, %v899_v12 }
 0x30f   : > { %1829 = vpow2.f32 %v1643_v41  ;;  %v943_v41 = vsub.f32 1.0, %v942_v10  ;;  %v957_v7 = vmul.f32 %v2696_v26, %v2599_v35  ;;  %v2747_v31 = vor.u32 1.1754944e-38, %v907_v36 }
 0x310   : > { %1831 = vrcp.f32 %v2667_v63  ;;  %v1040_v21 = vand.u32 2147483647, %v2648_v39  ;;  %v1042_v23 = vand.u32 2147483648, %v2648_v39  ;;  %v950_v4 = vand.u32 2147483647, %v2572_v25 }
 0x311   : > { %v719_v37 = vpop.permute.xlu0 %718  ;;  %v944_v20 = vmul.f32 %v2651_v44, %v943_v41  ;;  %v958_v10 = vsub.f32 1.0, %v957_v7  ;;  %vm1036_vm9 = vweird.f32 %v2648_v39  ;;  %vm947_vm10 = vweird.f32 %v2651_v44 }
 0x312   : > { %v747_v47 = vmul.f32 %v1845_v18, %v719_v37  ;;  %v748_v59 = vmul.f32 %v1846_v1, %v719_v37  ;;  %v965_v18 = vand.u32 2147483647, %v2599_v35  ;;  %vm2767_vm11 = vcmp.eq.f32.partialorder %v1040_v21, 8.507059e+37 }
 0x313   : > { %v1826_v51 = vpop.eup %1825  ;;  %v1043_v48 = vor.u32 1.1754944e-38, %v1042_v23  ;;  %vm1051_vm12 = vweird.f32 %v2667_v63  ;;  %v1057_v12 = vand.u32 2147483648, %v2667_v63  ;;  %v945_v36 = vadd.f32 %v2651_v44, %v944_v20 }
 0x314   : > { %v2708_v54 = vpop.eup %1827  ;;  %v2710_v33 = vadd.f32 1.0, %v1826_v51  ;;  %v2712_v55 = vadd.f32 %v769_v6, %v747_v47  ;;  %v2714_v46 = vadd.f32 %v769_v6, %v748_v59  ;;  %v1055_v6 = vand.u32 2147483647, %v2667_v63 }
 0x315   : > { %v1830_v43 = vpop.eup %1829  ;;  %v1032_v13 = vmul.f32 %v2708_v54, %v2648_v39  ;;  %vm1037_vm13 = vweird.f32 %v2708_v54  ;;  %vm962_vm14 = vweird.f32 %v2696_v26  ;;  %v959_v7 = vmul.f32 %v2696_v26, %v958_v10 }
 0x316   : > { %v2726_v28 = vadd.f32 1.0, %v1830_v43  ;;  %1833 = vrcp.f32 %v2710_v33  ;;  %v1632_v9 = vmul.f32 -1.442695, %v2712_v55  ;;  %v1633_v60 = vmul.f32 -1.442695, %v2714_v46  ;;  %v2731_v32 = vpop.eup %1831  ;;  %vm2802_vm0 = vmor %vm1036_vm9, %vm1037_vm13 }
 0x317   : > { %v1033_v2 = vsub.f32 1.0, %v1032_v13  ;;  %v1047_v37 = vmul.f32 %v2731_v32, %v2667_v63  ;;  %vm1066_vm15 = vweird.f32 %v2710_v33  ;;  %v1072_v21 = vand.u32 2147483648, %v2710_v33  ;;  %vm2817_vm9 = vmor %vm946_vm8, %vm947_vm10 }
 0x318   : > { %1835 = vrcp.f32 %v2726_v28  ;;  %vm2786_vm2 = vcmp.eq.f32.partialorder %v950_v4, 8.507059e+37  ;;  %vm961_vm3 = vweird.f32 %v2599_v35  ;;  %vm1081_vm5 = vweird.f32 %v2726_v28 }
 0x319   : > { %1837 = vpow2.f32 %v1632_v9  ;;  %v1034_v3 = vmul.f32 %v2708_v54, %v1033_v2  ;;  %v1048_v51 = vsub.f32 1.0, %v1047_v37  ;;  %v1070_v2 = vand.u32 2147483647, %v2710_v33 }
 0x31a   : > { %1839 = vpow2.f32 %v1633_v60  ;;  %vm1052_vm6 = vweird.f32 %v2731_v32  ;;  %v1085_v45 = vand.u32 2147483647, %v2726_v28  ;;  %v1087_v38 = vand.u32 2147483648, %v2726_v28 }
 0x31b   : > { %v1035_v13 = vadd.f32 %v2708_v54, %v1034_v3  ;;  %v1049_v41 = vmul.f32 %v2731_v32, %v1048_v51  ;;  %vm2826_vm1 = vmor %vm1051_vm12, %vm1052_vm6  ;;  %vm1071_vm10 = vcmp.eq.f32.partialorder %v1070_v2, 8.507059e+37  ;;  %vm2844_vm12 = vcmp.eq.f32.partialorder %v890_v15, 8.507059e+37 }
 0x31c   : > { %v1834_v1 = vpop.eup %1833  ;;  %v953_v59 = vor.u32 1.1754944e-38, %v952_v14 }
 0x31d   : > { %v1062_v34 = vmul.f32 %v1834_v1, %v2710_v33  ;;  %vm1067_vm4 = vweird.f32 %v1834_v1  ;;  %v1362_v33 = vld [vmem:[#allocation2] sm:$0xf] }
 0x31e   : > { %v1836_v43 = vpop.eup %1835  ;;  %vm1068_vm8 = vmor %vm1066_vm15, %vm1067_vm4 }
 0x31f   : > { %v1838_v9 = vpop.eup %1837  ;;  %v1063_v60 = vsub.f32 1.0, %v1062_v34  ;;  %v1077_v23 = vmul.f32 %v1836_v43, %v2726_v28  ;;  %vm1082_vm13 = vweird.f32 %v1836_v43  ;;  %vm2866_vm4 = vmor %vm961_vm3, %vm962_vm14  ;;  %vm966_vm14 = vcmp.eq.f32.partialorder %v965_v18, 8.507059e+37 }
 0x320   : > { %v1840_v3 = vpop.eup %1839  ;;  %v2791_v37 = vadd.f32 1.0, %v1838_v9  ;;  %v1050_v9 = vadd.f32 %v2731_v32, %v1049_v41  ;;  %vm1083_vm15 = vmor %vm1081_vm5, %vm1082_vm13  ;;  %vm3212_vm5 = vweird.f32 %v2535_v53 }
 0x321   : > { %v2796_v10 = vadd.f32 1.0, %v1840_v3  ;;  %v1064_v51 = vmul.f32 %v1834_v1, %v1063_v60  ;;  %v1078_v34 = vsub.f32 1.0, %v1077_v23  ;;  %v1039_v60 = vsel %vm2802_vm0, %v2708_v54, %v1035_v13 }
 0x322   : > { %1841 = vrcp.f32 %v2791_v37  ;;  %v1073_v54 = vor.u32 1.1754944e-38, %v1072_v21  ;;  %v949_v13 = vsel %vm2817_vm9, %v2651_v44, %v945_v36  ;;  %v1044_v63 = vsel %vm2767_vm11, %v1043_v48, %v1039_v60 }
 0x323   : > { %1843 = vrcp.f32 %v2796_v10  ;;  %v1065_v41 = vadd.f32 %v1834_v1, %v1064_v51  ;;  %v1079_v23 = vmul.f32 %v1836_v43, %v1078_v34  ;;  %v960_v51 = vadd.f32 %v2696_v26, %v959_v7 }
 0x324   : > { %v1054_v47 = vsel %vm2826_vm1, %v2731_v32, %v1050_v9  ;;  %v1088_v44 = vor.u32 1.1754944e-38, %v1087_v38  ;;  %vm1086_vm11 = vcmp.eq.f32.partialorder %v1085_v45, 8.507059e+37  ;;  %vm1056_vm1 = vcmp.eq.f32.partialorder %v1055_v6, 8.507059e+37 }
 0x325   : > { %v1069_v34 = vsel %vm1068_vm8, %v1834_v1, %v1065_v41  ;;  %v1080_v4 = vadd.f32 %v1836_v43, %v1079_v23  ;;  %v1058_v1 = vor.u32 1.1754944e-38, %v1057_v12  ;;  %vm2855_vm0 = vcmp.eq.f32.partialorder %v905_v22, 8.507059e+37 }
 0x326   : > { %v1074_v2 = vsel %vm1071_vm10, %v1073_v54, %v1069_v34  ;;  %v1131_v28 = vmul.f32 %v1044_v63, %v2555_v42  ;;  %v954_v25 = vsel %vm2786_vm2, %v953_v59, %v949_v13  ;;  %v964_v42 = vsel %vm2866_vm4, %v2696_v26, %v960_v51  ;;  %v1686_v63 = vld [vmem:[%s3158_s4 + $0x8] sm:$0xff] }
 0x327   : > { %v1133_v48 = vmul.f32 %v1074_v2, %v2605_v16  ;;  %v1084_v36 = vsel %vm1083_vm15, %v1836_v43, %v1080_v4  ;;  %v1059_v38 = vsel %vm1056_vm1, %v1058_v1, %v1054_v47  ;;  %vm3211_vm2 = vweird.f32 %v2597_v49  ;;  %v1688_v2 = vld [vmem:[%s3158_s4 + $0x18] sm:$0xff] }
 0x328   : > { %v1842_v15 = vpop.eup %1841  ;;  %v1089_v32 = vsel %vm1086_vm11, %v1088_v44, %v1084_v36  ;;  %vm2880_vm6 = vmor %vm3212_vm5, %vm3211_vm2  ;;  %v1132_v43 = vmul.f32 %v1059_v38, %v2557_v62  ;;  %v1125_v7 = vmul.f32 %v954_v25, %v2493_v27  ;;  %v1150_v18 = vpack.c.bf16 %v1131_v28, %v2722_v58  ;;  %v1145_v44 = vld [vmem:[%s3158_s4 + $0x20] sm:$0xf]  ;;  %v1304_v36 = vld [vmem:[#allocation2 + $0x118] sm:$0xf] }
 0x329   : > { %v1844_v16 = vpop.eup %1843  ;;  %v1152_v22 = vpack.c.bf16 %v2576_v5, %v1133_v48  ;;  %v1134_v14 = vmul.f32 %v1089_v32, %v2608_v50  ;;  %v912_v47 = vmul.f32 %v1842_v15, %v2791_v37  ;;  %v3215_v5 = vand.u32 2147483648, %v2599_v35  ;;  %v1426_v48 = vld [vmem:[#allocation2 + $0x30] sm:$0xf] }
 0x32a   : > { %v904_v26 = vsel %vm2880_vm6, %v2597_v49, %v2745_v17  ;;  %v927_v12 = vmul.f32 %v1844_v16, %v2796_v10  ;;  %v922_v20 = vand.u32 2147483648, %v2791_v37  ;;  %vm917_vm3 = vweird.f32 %v1842_v15 }
 0x32b   : > { %v968_v50 = vor.u32 1.1754944e-38, %v3215_v5  ;;  %1196 = vmatpush.bf16.msra.mxu1 %v1152_v22  ;;  %1690 = vmatpush.bf16.msra.mxu3 %v1152_v22  ;;  %v1153_v53 = vpack.c.bf16 %v2583_v8, %v1134_v14  ;;  %v913_v21 = vsub.f32 1.0, %v912_v47  ;;  %v920_v49 = vand.u32 2147483647, %v2791_v37 }
 0x32c   : > { %v928_v9 = vsub.f32 1.0, %v927_v12  ;;  %v937_v17 = vand.u32 2147483648, %v2796_v10  ;;  %v3216_v62 = vsel %vm2740_vm7, %v2570_v24, %v2717_v19  ;;  %vm932_vm9 = vweird.f32 %v1844_v16 }
 0x32d   : > { %v969_v35 = vsel %vm966_vm14, %v968_v50, %v964_v42  ;;  %1694 = vmatpush.bf16.msra.mxu2 %v1153_v53  ;;  %v914_v60 = vmul.f32 %v1842_v15, %v913_v21  ;;  %v894_v27 = vsel %vm2844_vm12, %v2694_v0, %v3216_v62  ;;  %v935_v58 = vand.u32 2147483647, %v2796_v10 }
 0x32e   : > { %v929_v8 = vmul.f32 %v1844_v16, %v928_v9  ;;  %v1151_v39 = vpack.c.bf16 %v1132_v43, %v2734_v11  ;;  %v1126_v41 = vmul.f32 %v969_v35, %v2495_v29  ;;  %vm916_vm13 = vweird.f32 %v2791_v37 }
 0x32f   : > { %1197 = vmatpush.bf16.msra.mxu1 %v1150_v18  ;;  %1691 = vmatpush.bf16.msra.mxu3 %v1150_v18  ;;  %v915_v23 = vadd.f32 %v1842_v15, %v914_v60  ;;  %vm918_vm8 = vmor %vm916_vm13, %vm917_vm3  ;;  %v923_v56 = vor.u32 1.1754944e-38, %v922_v20  ;;  %v909_v24 = vsel %vm2855_vm0, %v2747_v31, %v904_v26  ;;  %vm931_vm7 = vweird.f32 %v2796_v10  ;;  %v1455_v18 = vld [vmem:[#allocation2 + $0xf8] sm:$0xf] }
 0x330   : > { %v930_v0 = vadd.f32 %v1844_v16, %v929_v8  ;;  %v1148_v19 = vpack.c.bf16 %v2684_v30, %v1125_v7  ;;  %vm921_vm10 = vcmp.eq.f32.partialorder %v920_v49, 8.507059e+37  ;;  %vm933_vm12 = vmor %vm931_vm7, %vm932_vm9  ;;  %v938_v29 = vor.u32 1.1754944e-38, %v937_v17  ;;  %v1484_v49 = vld [vmem:[#allocation2 + $0xd0] sm:$0xf] }
 0x331   : > { %1695 = vmatpush.bf16.msra.mxu2 %v1151_v39  ;;  %v919_v3 = vsel %vm918_vm8, %v1842_v15, %v915_v23  ;;  %v1121_v37 = vmul.f32 %v894_v27, %v2443_v57  ;;  %vm936_vm15 = vcmp.eq.f32.partialorder %v935_v58, 8.507059e+37  ;;  %v1149_v31 = vpack.c.bf16 %v2692_v52, %v1126_v41  ;;  %v1685_v57 = vld [vmem:[%s3158_s4] sm:$0xff] }
 0x332   : > { %v924_v11 = vsel %vm921_vm10, %v923_v56, %v919_v3  ;;  %v934_v54 = vsel %vm933_vm12, %v1844_v16, %v930_v0  ;;  %v1122_v51 = vmul.f32 %v909_v24, %v2451_v61  ;;  %vm3217_vm11 = vcmask 523264   ;;  %v1687_v61 = vld [vmem:[%s3158_s4 + $0x10] sm:$0xff]  ;;  %v1333_v52 = vld [vmem:[#allocation2 + $0x40] sm:$0xf] }
 0x333   : > { %1198 = vmatpush.bf16.msra.mxu1 %v1148_v19  ;;  %1692 = vmatpush.bf16.msra.mxu3 %v1148_v19  ;;  %v1123_v13 = vmul.f32 %v924_v11, %v2712_v55  ;;  %v939_v10 = vsel %vm936_vm15, %v938_v29, %v934_v54  ;;  %vm3218_vm1 = vmmov %vm3217_vm11  ;;  %v1397_v55 = vld [vmem:[#allocation2 + $0x20] sm:$0xf]  ;;  %v1171_v1 = vunpack.c.l.b16 %v1145_v44  ;;  %vm1295_vm12 = vcmask 138240  }
 0x334   : > { %v1124_v30 = vmul.f32 %v939_v10, %v2714_v46  ;;  %vm3219_vm0 = vmmov %vm3218_vm1  ;;  %1347 = vrot.lane.b32.xlu0 %v1333_v52, %s1951_s18  ;;  %1413 = vrot.lane.b32.xlu1 %v1397_v55, %s1949_s19  ;;  %v1276_v46 = vld [vmem:[#allocation2 + $0xb0] sm:$0xf]  ;;  %v1511_v19 = vld [vmem:[%s3159_s5] sm:$0xf]  ;;  %v3227_v55 = vmov 0  }
 0x335   : > { %1696 = vmatpush.bf16.msra.mxu2 %v1149_v31  ;;  %v1146_v34 = vpack.c.bf16 %v1123_v13, %v1121_v37  ;;  %vm3220_vm4 = vmmov %vm3219_vm0  ;;  %1289 = vrot.lane.b32.xlu2 %v1276_v46, %s1952_s15  ;;  %v1176_v59 = vpack.c.b16 %v1171_v1, %v1171_v1 }
 0x336   : > { %v1147_v4 = vpack.c.bf16 %v1124_v30, %v1122_v51  ;;  %vm3221_vm2 = vmmov %vm3219_vm0 }
 0x337   : > { %1199 = vmatpush.bf16.msra.mxu1 %v1146_v34  ;;  %1693 = vmatpush.bf16.msra.mxu3 %v1146_v34  ;;  %vm3222_vm5 = vmmov %vm3219_vm0  ;;  %v1279_v34 = vld [vmem:[%s3160_s6] ss:$8 sm:$0x3] }
 0x338   : > { %vm3223_vm6 = vmmov %vm3219_vm0  ;;  %vm1280_vm13 = vcmp.gt.f32.partialorder %v1279_v34, 0.5 }
 0x339   : > { %1697 = vmatpush.bf16.msra.mxu2 %v1147_v4  ;;  %vm3224_vm14 = vmmov %vm3219_vm0  ;;  %v1281_v46 = vsel %vm1280_vm13, 1, %v3227_v55 }
 0x33a   : > { %1662 = vmatmul.msk.bf16.vlgmr.msra.gmra.mxu1 %vm3217_vm11, %v1685_v57  ;;  %1663 = vmatmul.msk.bf16.vlgmr.msra.gmra.mxu3 %vm3218_vm1, %v1686_v63  ;;  %vm3225_vm3 = vmmov %vm3219_vm0  ;;  %v1283_v44 = vperm.slane %v1281_v46, 1  ;;  %vm1324_vm1 = vcmask 130048  }
 0x33b   : > { %1229 = vmatpush.bf16.msrb.mxu1 %v1153_v53  ;;  %vm3226_vm9 = vmmov %vm3219_vm0 }
 0x33c   : > { %1668 = vmatmul.msk.bf16.vlgmr.msra.gmra.mxu2 %vm3219_vm0, %v1686_v63  ;;  %1376 = vrot.lane.b32.xlu0 %v1362_v33, %s1947_s29  ;;  %v1673_v63 = vld [vmem:[%s3160_s6 + $0x2] ss:$8 sm:$0x3]  ;;  %vm3000_vm15 = vcmp.eq.s32.totalorder %v1283_v44, 1  ;;  %vm1353_vm0 = vcmask 121856  }
 0x33d   : > { %1442 = vrot.lane.b32.xlu1 %v1426_v48, %s1953_s16  ;;  %1318 = vrot.lane.b32.xlu2 %v1304_v36, %s1954_s21  ;;  %vm1338_vm7 = vcmp.gt.f32.partialorder %v1673_v63, 0.5 }
 0x33f   : > { %1230 = vmatpush.bf16.msrb.mxu1 %v1151_v39 }
 0x343   : > { %1231 = vmatpush.bf16.msrb.mxu1 %v1149_v31 }
 0x347   : > { %1232 = vmatpush.bf16.msrb.mxu1 %v1147_v4  ;;  %v1672_v4 = vld [vmem:[%s3160_s6 + $0x1] ss:$8 sm:$0x3] }
 0x348   : > { %vm1309_vm8 = vcmp.gt.f32.partialorder %v1672_v4, 0.5 }
 0x349   : > { %v1310_v33 = vsel %vm1309_vm8, 1, %v3227_v55  ;;  %vm1415_vm8 = vcmask 1039360  }
 0x34a   : > { %1664 = vmatmul.msk.bf16.gmra.mxu3 %vm3220_vm4, %v1687_v61  ;;  %1667 = vmatmul.msk.bf16.vlgmr.msrb.gmra.mxu1 %vm3221_vm2, %v1685_v57  ;;  %v1312_v1 = vperm.slane %v1310_v33, 1 }
 0x34c   : > { %1669 = vmatmul.msk.bf16.gmra.mxu2 %vm3222_vm5, %v1687_v61  ;;  %vm1314_vm11 = vcmp.eq.s32.totalorder %v1312_v1, 1  ;;  %vm1382_vm5 = vcmask 7168  }
 0x35a   : > { %1665 = vmatmul.msk.bf16.gmra.mxu3 %vm3223_vm6, %v1688_v2 }
 0x35c   : > { %1670 = vmatmul.msk.bf16.gmra.mxu2 %vm3224_vm14, %v1688_v2  ;;  %v1674_v2 = vld [vmem:[%s3160_s6 + $0x3] ss:$8 sm:$0x3] }
 0x35d   : > { %vm1367_vm10 = vcmp.gt.f32.partialorder %v1674_v2, 0.5 }
 0x36a   : > { %1666 = vmatmul.msk.bf16.gmra.mxu3 %vm3225_vm3, %v1176_v59 }
 0x36c   : > { %1671 = vmatmul.msk.bf16.gmra.mxu2 %vm3226_vm9, %v1176_v59  ;;  %v1339_v59 = vsel %vm1338_vm7, 1, %v3227_v55 }
 0x36d   : > { %v1341_v48 = vperm.slane %v1339_v59, 1 }
 0x36f   : > { %vm1343_vm4 = vcmp.eq.s32.totalorder %v1341_v48, 1 }
 0x38f   : > { %v2969_v3 = vpop.permute.xlu2 %1289 }
 0x397   : > { %v1319_v11 = vpop.permute.xlu2 %1318 }
 0x3a6   : > { %v2971_v29 = vpop.permute.xlu1 %1413  ;;  %v2975_v54 = vpop.permute.xlu0 %1347 }
 0x3ae   : > { %v2979_v51 = vpop.permute.xlu0 %1376 }
 0x3af   : > { %v2973_v37 = vpop.permute.xlu1 %1442 }
 0x3b7   : > { %v1201_v40 = vpop.f32.mrf.mxu1 }
 0x3b8   : > { %1258 = vst [vmem:[#allocation2 + $0xb8] sm:$0xff] %v1201_v40 }
 0x3bd   : > { %v1206_v15 = vpop.f32.mrf.mxu3 }
 0x3be   : > { %1262 = vst [vmem:[#allocation2 + $0xc8] sm:$0xff] %v1206_v15 }
 0x3bf   : > { %v1239_v32 = vpop.f32.mrf.mxu2  ;;  %v1203_v28 = vpop.f32.mrf.mxu1  ;;  %v1277_v38 = vld [vmem:[#allocation2 + $0xb8] sm:$0xf] }
 0x3c0   : > { %1263 = vst [vmem:[#allocation2 + $0x50] sm:$0xff] %v1239_v32  ;;  %1291 = vrot.lane.b32.xlu1 %v1277_v38, %s1952_s15 }
 0x3c1   : > { %1260 = vst [vmem:[#allocation2 + $0x28] sm:$0xff] %v1203_v28  ;;  %v1675_v28 = vld [vmem:[%s3160_s6 + $0x4] ss:$8 sm:$0x3] }
 0x3c2   : > { %vm1400_vm2 = vcmp.gt.f32.partialorder %v1675_v28, 0.5 }
 0x3c5   : > { %v1208_v25 = vpop.f32.mrf.mxu3  ;;  %v1334_v45 = vld [vmem:[#allocation2 + $0xc8] sm:$0xf] }
 0x3c6   : > { %1264 = vst [vmem:[#allocation2 + $0x88] sm:$0xff] %v1208_v25  ;;  %1349 = vrot.lane.b32.xlu2 %v1334_v45, %s1951_s18  ;;  %v1368_v25 = vsel %vm1367_vm10, 1, %v3227_v55 }
 0x3c7   : > { %v1241_v16 = vpop.f32.mrf.mxu2  ;;  %v1234_v22 = vpop.f32.mrf.mxu1  ;;  %v1335_v14 = vld [vmem:[#allocation2 + $0x50] sm:$0xf] }
 0x3c8   : > { %1265 = vst [vmem:[#allocation2 + $0xf0] sm:$0xff] %v1241_v16  ;;  %1351 = vrot.lane.b32.xlu1 %v1335_v14, %s1951_s18  ;;  %v1305_v50 = vld [vmem:[#allocation2 + $0x28] sm:$0xf]  ;;  %s1621_s18 = sshll.u32 %s2083_s22, 3 }
 0x3c9   : > { %1259 = vst [vmem:[#allocation2 + $0x8] sm:$0xff] %v1234_v22 }
 0x3cd   : > { %v1211_v42 = vpop.f32.mrf.mxu3  ;;  %v1363_v47 = vld [vmem:[#allocation2 + $0x88] sm:$0xf] }
 0x3ce   : > { %1266 = vst [vmem:[#allocation2 + $0x108] sm:$0xff] %v1211_v42  ;;  %1378 = vrot.lane.b32.xlu2 %v1363_v47, %s1947_s29  ;;  %v1370_v42 = vperm.slane %v1368_v25, 1 }
 0x3cf   : > { %v1244_v6 = vpop.f32.mrf.mxu2  ;;  %v1236_v5 = vpop.f32.mrf.mxu1  ;;  %v1364_v43 = vld [vmem:[#allocation2 + $0xf0] sm:$0xf] }
 0x3d0   : > { %1267 = vst [vmem:[#allocation2 + $0x60] sm:$0xff] %v1244_v6  ;;  %1320 = vrot.lane.b32.xlu1 %v1305_v50, %s1954_s21  ;;  %v1278_v26 = vld [vmem:[#allocation2 + $0x8] sm:$0xf]  ;;  %v1311_v6 = vperm.slane %v1310_v33, 0  ;;  %vm3020_vm6 = vcmp.eq.s32.totalorder %v1370_v42, 1 }
 0x3d1   : > { %1261 = vst [vmem:[#allocation2 + $0x90] sm:$0xff] %v1236_v5  ;;  %1293 = vrot.lane.b32.xlu0 %v1278_v26, %s1952_s15  ;;  %v1282_v5 = vperm.slane %v1281_v46, 0  ;;  %v1676_v26 = vld [vmem:[%s3160_s6 + $0x5] ss:$8 sm:$0x3]  ;;  %s1689_s15 = sshll.u32 %s2018_s28, 3 }
 0x3d2   : > { %vm3026_vm14 = vcmp.eq.s32.totalorder %v1311_v6, 1  ;;  %vm1429_vm3 = vcmp.gt.f32.partialorder %v1676_v26, 0.5  ;;  %s1538_s9 = scalar_lea.hbm %s3161_s7, %s1689_s15  ;;  %s298_s28 = scalar_lea.vmem [#allocation6], %s1621_s18 }
 0x3d3   : > { %vm3037_vm9 = vcmp.eq.s32.totalorder %v1282_v5, 1  ;;  %s1540_s12 = sshll.u32 %s298_s28, 4  ;;  %s1541_s12 = int_to_ptr.vmem [resolvable:$true] %s1540_s12 }
 0x3d5   : > { %v1213_v12 = vpop.f32.mrf.mxu3 }
 0x3d6   : > { %1268 = vst [vmem:[#allocation2 + $0xa8] sm:$0xff] %v1213_v12  ;;  %v1401_v12 = vsel %vm1400_vm2, 1, %v3227_v55 }
 0x3d7   : > { %v1246_v53 = vpop.f32.mrf.mxu2  ;;  %v1402_v33 = vperm.slane %v1401_v12, 0 }
 0x3d8   : > { %1269 = vst [vmem:[#allocation2 + $0x68] sm:$0xff] %v1246_v53  ;;  %1380 = vrot.lane.b32.xlu1 %v1364_v43, %s1947_s29  ;;  %v1306_v7 = vld [vmem:[#allocation2 + $0x90] sm:$0xf]  ;;  %s1956_s29 = smov 111  }
 0x3d9   : > { %1322 = vrot.lane.b32.xlu0 %v1306_v7, %s1954_s21  ;;  %s1527_s21 = scalar_lea.sflag [#allocation5], %s2083_s22 }
 0x3dd   : > { %v1216_v21 = vpop.f32.mrf.mxu3  ;;  %v1395_v9 = vld [vmem:[#allocation2 + $0xa8] sm:$0xf] }
 0x3de   : > { %1270 = vst [vmem:[#allocation2 + $0x110] sm:$0xff] %v1216_v21 }
 0x3df   : > { %v1249_v35 = vpop.f32.mrf.mxu2  ;;  %v1396_v20 = vld [vmem:[#allocation2 + $0x68] sm:$0xf] }
 0x3e0   : > { %1271 = vst [vmem:[#allocation2 + $0xe8] sm:$0xff] %v1249_v35  ;;  %1411 = vrot.lane.b32.xlu2 %v1396_v20, %s1949_s19  ;;  %1471 = vrot.lane.b32.xlu1 %v1455_v18, %s1955_s23  ;;  %v1677_v35 = vld [vmem:[%s3160_s6 + $0x6] ss:$8 sm:$0x3] }
 0x3e1   : > { %1409 = vrot.lane.b32.xlu0 %v1395_v9, %s1949_s19  ;;  %v1340_v9 = vperm.slane %v1339_v59, 0  ;;  %vm1458_vm13 = vcmp.gt.f32.partialorder %v1677_v35, 0.5 }
 0x3e3   : > { %vm3048_vm10 = vcmp.eq.s32.totalorder %v1340_v9, 1 }
 0x3e5   : > { %v1218_v60 = vpop.f32.mrf.mxu3  ;;  %v1424_v17 = vld [vmem:[#allocation2 + $0x110] sm:$0xf] }
 0x3e6   : > { %1272 = vst [vmem:[#allocation2 + $0x10] sm:$0xff] %v1218_v60  ;;  %v1678_v60 = vld [vmem:[%s3160_s6 + $0x7] ss:$8 sm:$0x3] }
 0x3e7   : > { %v1251_v62 = vpop.f32.mrf.mxu2  ;;  %v1425_v27 = vld [vmem:[#allocation2 + $0xe8] sm:$0xf]  ;;  %vm1487_vm7 = vcmp.gt.f32.partialorder %v1678_v60, 0.5 }
 0x3e8   : > { %1273 = vst [vmem:[#allocation2 + $0x70] sm:$0xff] %v1251_v62  ;;  %1440 = vrot.lane.b32.xlu2 %v1425_v27, %s1953_s16  ;;  %1500 = vrot.lane.b32.xlu1 %v1484_v49, %s1956_s29  ;;  %v1403_v62 = vperm.slane %v1401_v12, 1  ;;  %v1488_v63 = vsel %vm1487_vm7, 1, %v3227_v55 }
 0x3e9   : > { %1438 = vrot.lane.b32.xlu0 %v1424_v17, %s1953_s16  ;;  %v1489_v21 = vperm.slane %v1488_v63, 0  ;;  %s1542_s16 = sshll.u32 %s1538_s9, 4  ;;  %s1543_s16 = int_to_ptr.hbm [resolvable:$true] %s1542_s16 }
 0x3ed   : > { %v1221_v8 = vpop.f32.mrf.mxu3  ;;  %v1453_v41 = vld [vmem:[#allocation2 + $0x10] sm:$0xf] }
 0x3ee   : > { %1274 = vst [vmem:[#allocation2 + $0x48] sm:$0xff] %v1221_v8 }
 0x3ef   : > { %v1254_v58 = vpop.f32.mrf.mxu2  ;;  %v1454_v39 = vld [vmem:[#allocation2 + $0x70] sm:$0xf] }
 0x3f0   : > { %1275 = vst [vmem:[#allocation2 + $0xd8] sm:$0xff] %v1254_v58  ;;  %1469 = vrot.lane.b32.xlu2 %v1454_v39, %s1955_s23 }
 0x3f1   : > { %1467 = vrot.lane.b32.xlu0 %v1453_v41, %s1955_s23  ;;  %v1430_v41 = vsel %vm1429_vm3, 1, %v3227_v55  ;;  %s1891_s23 = sshra.s32 %s1543_s16, 4  ;;  %s1892_s23 = int_to_ptr.hbm [resolvable:$true] %s1891_s23 }
 0x3f2   : > { %v1432_v4 = vperm.slane %v1430_v41, 1  ;;  %p1898_p0 = scmp.lt.s32.totalorder %s1892_s23, %s3161_s7 }
 0x3f5   : > { %v1223_v23 = vpop.f32.mrf.mxu3  ;;  %v1482_v56 = vld [vmem:[#allocation2 + $0x48] sm:$0xf] }
 0x3f7   : > { %v1483_v24 = vld [vmem:[#allocation2 + $0xd8] sm:$0xf]  ;;  %v1256_v0 = vpop.f32.mrf.mxu2 }
 0x3f8   : > { %1498 = vrot.lane.b32.xlu2 %v1483_v24, %s1956_s29  ;;  %v1369_v24 = vperm.slane %v1368_v25, 0 }
 0x3f9   : > { %1496 = vrot.lane.b32.xlu0 %v1482_v56, %s1956_s29  ;;  %s1893_s29 = scalar_lea.hbm %s1892_s23, 8 }
 0x3fa   : > { %p1894_p6 = scmp.ne.s32.totalorder %s1892_s23, %s1893_s29  ;;  %p1899_p1 = scmp.lt.s32.totalorder %s1897_s17, %s1893_s29 }
 0x3fc   : > { %p1895_p9 = pnand %p1894_p6, %p2047_p11  ;;  %p1900_p3 = por %p1899_p1, %p1898_p0 }
 0x3fe   : > { %p1896_p13 = pneg %p1895_p9 }
 0x400   : > { %1514 = vperm.xlu2 %1760, %v1511_v19   ;;  %p1901_p4 = pnand %p1900_p3, %p1896_p13 }
 0x420   : > { %v2977_v31 = vpop.permute.xlu2 %1349 }
 0x421   : > { %v1354_v19 = vsel %vm1353_vm0, %v2975_v54, %v2977_v31 }
 0x422   : > { %v1358_v54 = vsel %vm3048_vm10, %v1354_v19, 0.0 }
 0x428   : > { %v2981_v30 = vpop.permute.xlu2 %1378 }
 0x429   : > { %v1383_v2 = vsel %vm1382_vm5, %v2979_v51, %v2981_v30 }
 0x432   : > { %v1292_v13 = vpop.permute.xlu1 %1291 }
 0x433   : > { %v1296_v17 = vsel %vm1295_vm12, %v2969_v3, %v1292_v13 }
 0x434   : > { %v1300_v0 = vsel %vm3037_vm9, %v1296_v17, 0.0  ;;  %vm1491_vm9 = vcmp.eq.s32.totalorder %v1489_v21, 1 }
 0x43a   : > { %v1352_v10 = vpop.permute.xlu1 %1351  ;;  %v2992_v61 = vpop.permute.xlu2 %1411 }
 0x43b   : > { %v1355_v14 = vsel %vm1353_vm0, %v2977_v31, %v1352_v10  ;;  %v1459_v10 = vsel %vm1458_vm13, 1, %v3227_v55  ;;  %v1417_v34 = vsel %vm1415_vm8, %v2992_v61, %v2971_v29  ;;  %v1490_v55 = vperm.slane %v1488_v63, 1 }
 0x43c   : > { %v1359_v50 = vsel %vm1343_vm4, %v1355_v14, 0.0  ;;  %v1461_v46 = vperm.slane %v1459_v10, 1  ;;  %vm1473_vm0 = vcmask 916480   ;;  %vm1502_vm4 = vcmask 908288  }
 0x43d   : > { %vm1522_vm13 = vcmask 1043456  }
 0x43e   : > { %vm3082_vm2 = vcmp.eq.s32.totalorder %v1461_v46, 1 }
 0x442   : > { %v1321_v57 = vpop.permute.xlu1 %1320  ;;  %v3010_v45 = vpop.permute.xlu2 %1440 }
 0x443   : > { %v1294_v52 = vpop.permute.xlu0 %1293  ;;  %v1325_v18 = vsel %vm1324_vm1, %v1319_v11, %v1321_v57 }
 0x444   : > { %v1297_v40 = vsel %vm1295_vm12, %v1292_v13, %v1294_v52  ;;  %v1329_v58 = vsel %vm3026_vm14, %v1325_v18, 0.0  ;;  %vm3057_vm12 = vcmp.eq.s32.totalorder %v1403_v62, 1  ;;  %v1392_v13 = vld [vmem:[#allocation2 + $0x60] sm:$0xf] }
 0x445   : > { %v1301_v16 = vsel %vm3000_vm15, %v1297_v40, 0.0  ;;  %v1331_v11 = vadd.f32 %v1329_v58, %v1300_v0  ;;  %vm1444_vm15 = vcmask 924672   ;;  %v1421_v29 = vsel %vm3057_vm12, %v1417_v34, 0.0 }
 0x446   : > { %v1446_v1 = vsel %vm1444_vm15, %v3010_v45, %v2973_v37 }
 0x447   : > { %v1360_v44 = vadd.f32 %v1358_v54, %v1331_v11 }
 0x44a   : > { %v1381_v15 = vpop.permute.xlu1 %1380  ;;  %v1470_v23 = vpop.permute.xlu2 %1469 }
 0x44b   : > { %v1323_v32 = vpop.permute.xlu0 %1322  ;;  %v1384_v43 = vsel %vm1382_vm5, %v2981_v30, %v1381_v15  ;;  %vm3086_vm5 = vcmp.eq.s32.totalorder %v1402_v33, 1  ;;  %v1431_v30 = vperm.slane %v1430_v41, 0 }
 0x44c   : > { %v1326_v38 = vsel %vm1324_vm1, %v1321_v57, %v1323_v32  ;;  %v1388_v27 = vsel %vm3020_vm6, %v1384_v43, 0.0  ;;  %vm1434_vm1 = vcmp.eq.s32.totalorder %v1432_v4, 1  ;;  %vm3090_vm6 = vcmp.eq.s32.totalorder %v1490_v55, 1 }
 0x44d   : > { %v1330_v22 = vsel %vm1314_vm11, %v1326_v38, 0.0  ;;  %vm3068_vm11 = vcmp.eq.s32.totalorder %v1369_v24, 1  ;;  %v1450_v15 = vsel %vm1434_vm1, %v1446_v1, 0.0  ;;  %v1460_v38 = vperm.slane %v1459_v10, 0 }
 0x44e   : > { %v1332_v47 = vadd.f32 %v1330_v22, %v1301_v16  ;;  %v1387_v36 = vsel %vm3068_vm11, %v1383_v2, 0.0  ;;  %vm3098_vm14 = vcmp.eq.s32.totalorder %v1431_v30, 1 }
 0x44f   : > { %v1389_v28 = vadd.f32 %v1387_v36, %v1360_v44  ;;  %vm3110_vm3 = vcmp.eq.s32.totalorder %v1460_v38, 1 }
 0x450   : > { %v1361_v7 = vadd.f32 %v1359_v50, %v1332_v47  ;;  %v1391_v50 = vld [vmem:[#allocation2 + $0x108] sm:$0xf] }
 0x451   : > { %v1393_v43 = vadd.f32 %v1391_v50, %v1389_v28 }
 0x452   : > { %v1472_v8 = vpop.permute.xlu1 %1471  ;;  %v1390_v39 = vadd.f32 %v1388_v27, %v1361_v7  ;;  %v1499_v32 = vpop.permute.xlu2 %1498 }
 0x453   : > { %v1410_v20 = vpop.permute.xlu0 %1409  ;;  %v1475_v16 = vsel %vm1473_vm0, %v1470_v23, %v1472_v8 }
 0x454   : > { %v1394_v57 = vadd.f32 %v1392_v13, %v1390_v39  ;;  %v1416_v22 = vsel %vm1415_vm8, %v1410_v20, %v2992_v61  ;;  %v1479_v5 = vsel %vm3082_vm2, %v1475_v16, 0.0 }
 0x455   : > { %v1420_v26 = vsel %vm3086_vm5, %v1416_v22, 0.0 }
 0x456   : > { %v1423_v59 = vadd.f32 %v1421_v29, %v1394_v57  ;;  %v1422_v18 = vadd.f32 %v1420_v26, %v1393_v43 }
 0x458   : > { %v1452_v25 = vadd.f32 %v1450_v15, %v1423_v59 }
 0x45a   : > { %v1501_v48 = vpop.permute.xlu1 %1500  ;;  %v1481_v53 = vadd.f32 %v1479_v5, %v1452_v25  ;;  %v1515_v60 = vpop.permute.xlu2 %1514 }
 0x45b   : > { %v1439_v52 = vpop.permute.xlu0 %1438  ;;  %v1504_v14 = vsel %vm1502_vm4, %v1499_v32, %v1501_v48 }
 0x45c   : > { %v1445_v6 = vsel %vm1444_vm15, %v1439_v52, %v3010_v45  ;;  %v1508_v61 = vsel %vm3090_vm6, %v1504_v14, 0.0 }
 0x45d   : > { %v1449_v45 = vsel %vm3098_vm14, %v1445_v6, 0.0  ;;  %v1510_v35 = vadd.f32 %v1508_v61, %v1481_v53 }
 0x45e   : > { %v1451_v9 = vadd.f32 %v1449_v45, %v1422_v18 }
 0x45f   : > { %v1518_v17 = vadd.f32 %v1515_v60, %v1510_v35 }
 0x461   : > { %v1521_v39 = vrot.slane %v1518_v17, 4 }
 0x463   : > { %v1468_v42 = vpop.permute.xlu0 %1467 }
 0x464   : > { %v1474_v7 = vsel %vm1473_vm0, %v1468_v42, %v1470_v23 }
 0x465   : > { %v1478_v20 = vsel %vm3110_vm3, %v1474_v7, 0.0 }
 0x466   : > { %v1480_v62 = vadd.f32 %v1478_v20, %v1451_v9 }
 0x46b   : > { %v1497_v49 = vpop.permute.xlu0 %1496 }
 0x46c   : > { %v1503_v27 = vsel %vm1502_vm4, %v1497_v49, %v1499_v32 }
 0x46d   : > { %v1507_v8 = vsel %vm1491_vm9, %v1503_v27, 0.0 }
 0x46e   : > { %v1509_v58 = vadd.f32 %v1507_v8, %v1480_v62 }
 0x470   : > { %v1517_v41 = vadd.f32 %v1515_v60, %v1509_v58 }
 0x472   : > { %v1523_v23 = vsel %vm1522_vm13, %v1517_v41, %v1521_v39 }
 0x473   : > { %1525 = vst [vmem:[%s298_s28] sm:$0xff] %v1523_v23 }
 0x474   : > { %1904 = shalt.err (!%p1901_p4)
}
 0x475   : > { %1700 = dma.vmem_to_hbm [thread:$0]  (%p2047_p11), %s1541_s12, 128, %s1543_s16, %s1527_s21  }
 0x476 PF: > { %s1554_s22 = sand.u32 1, %s1931_s24   ;;  %p3252_p7 = scmp.ge.s32.totalorder %s1943_s27, 2 }
 0x477   : > { %s1555_s15 = scalar_lea.sflag [#allocation5], %s1554_s22 }
 0x478   : > { %p1707_p5 = pnand %p3252_p7, %p2051_p12 }
 0x47a   : > { %p1708_p8 = pneg %p1707_p5 }
 0x47c   : > { %1926 = dma.done.wait (%p1708_p8), %s1555_s15, 128  }
 0x47d   : > { %1928 = vsyncadd (%p1708_p8), %s1555_s15, 4294967168  ;;  %s3253_s20 = sld [smem:[#allocation9_spill]]  ;;  %p20_p10 = scmp.ge.s32.totalorder %s2022_s30, 4  }
 0x47e   : > { %s3254_s24 = smov %s1935_s25  ;;  %s3255_s25 = smov %s1939_s26 }
 0x47f   : > { %s3257_s27 = smov %s2022_s30  ;;  %22 = sbr.rel (!%p20_p10) target bundleno = 5 (0x5), region = 100 }
 0x483   : > { %s3256_s26 = smov %s3253_s20 }
 0x484   :  { %1561 = vsyncpa [#allocation4], 1 }
 0x485   :  { %1563 = vsyncpa [#allocation4 + $0x1], 1 }
 0x486   :  { %1564 = vsyncpa [#allocation5], 1 }
 0x487   :  { %1566 = vsyncpa [#allocation5 + $0x1], 1 }

</bundles_post_ra>
